<compile_context>
chip_gen: v7x
topology: tpu7x:2x2x1
jax: 0.10.0
libtpu: 0.0.40
codegen_flags: <defaults>
</compile_context>

<pallas_src>
import functools
import math

import jax
import jax.numpy as jnp
from jax.experimental import pallas as pl
from jax.experimental.pallas import tpu as pltpu


# ----------------------------------------------------------------------------
# Elementwise helpers.
# ----------------------------------------------------------------------------
_SQRT_2_OVER_PI = 0.7978845608028654


def _gelu(x):
    # tanh-approx GELU (max abs error vs torch's exact GELU ~3.4e-4); tanh runs
    # on the otherwise-idle EUP slot, everything else is mul/add on the VPU.
    return 0.5 * x * (1.0 + jnp.tanh(_SQRT_2_OVER_PI * (x + 0.044715 * x * x * x)))


# ----------------------------------------------------------------------------
# Pallas kernel: whole forward pass in one invocation (no grid; tiny problem).
# ----------------------------------------------------------------------------
def _kernel(x_ref, w1_ref, wsq_ref, bias_ref, w3_ref, out_ref,
            *, N, L, E, P, num_heads, head_dim):
    f32 = jnp.float32
    NL = N * L
    H = num_heads

    def b_(i, width=E):
        # Static ref slice -> (1, width) load of one bias row (no stack load).
        return bias_ref[i:i + 1, :width]

    # ---- linear1: Linear(2, E) -> Tanh -> Linear(E, E) -> GELU --------------
    # Contraction depth 2: two VPU rank-1 updates instead of an MXU push.
    h = x_ref[:, 0:1] * w1_ref[0:1, :] + x_ref[:, 1:2] * w1_ref[1:2, :] + b_(0)
    h = jnp.tanh(h)
    h = _gelu(jnp.dot(h, wsq_ref[0], preferred_element_type=f32) + b_(1))

    # ---- per-head lane masks (computed once; hoisted out of the block loop) -
    lane = jax.lax.broadcasted_iota(jnp.int32, (H, E), 1)
    head = jax.lax.broadcasted_iota(jnp.int32, (H, E), 0)
    lo = head * head_dim
    mask = jnp.where((lane >= lo) & (lane < lo + head_dim), 1.0, 0.0)     # (H, E)
    scale = 1.0 / math.sqrt(head_dim)
    qmask = (scale * mask)[None, :, None, :]                              # (1,H,1,E)
    vmask = mask[None, :, None, :]

    # ---- 3 x Attention block -------------------------------------------------
    # TODO(synk): attention dropout (p=0.05) is training-only; inference
    #             semantics (identity) are implemented here.
    for blk in range(3):
        wb = 1 + 5 * blk      # wsq rows for this block: [wq, wk, wv, wo, wl]
        bb = 2 + 5 * blk      # bias rows for this block: [bq, bk, bv, bo, bl]

        q = jnp.dot(h, wsq_ref[wb + 0], preferred_element_type=f32) + b_(bb + 0)
        k = jnp.dot(h, wsq_ref[wb + 1], preferred_element_type=f32) + b_(bb + 1)
        v = jnp.dot(h, wsq_ref[wb + 2], preferred_element_type=f32) + b_(bb + 2)

        # Fold heads into the batch dim via lane masks: head hh of batch n sits
        # at batch row n*H + hh.  Masked lanes contribute 0 to the contraction,
        # so this matches the per-head slicing exactly -- with no lane slices,
        # no concat, and a single batched softmax.
        qm = (q.reshape(N, 1, L, E) * qmask).reshape(N * H, L, E)
        km = jnp.broadcast_to(k.reshape(N, 1, L, E), (N, H, L, E)).reshape(N * H, L, E)
        vm = (v.reshape(N, 1, L, E) * vmask).reshape(N * H, L, E)

        s = jnp.einsum("ble,bme->blm", qm, km, preferred_element_type=f32)  # (NH,L,L)
        s = s - jnp.max(s, axis=-1, keepdims=True)
        p = jnp.exp(s)
        inv = pl.reciprocal(jnp.sum(p, axis=-1, keepdims=True), approx=True)
        probs = p * inv
        ctx = jnp.einsum("blm,bme->ble", probs, vm, preferred_element_type=f32)

        # Heads occupy disjoint lanes, so summing the H batch slabs IS the head
        # concat.  Unrolled static adds on leading dims (no relayout).
        ctx4 = ctx.reshape(N, H, L, E)
        merged = ctx4[:, 0]
        for hh in range(1, H):
            merged = merged + ctx4[:, hh]
        ctx2 = merged.reshape(NL, E)

        h = h + jnp.dot(ctx2, wsq_ref[wb + 3], preferred_element_type=f32) + b_(bb + 3)
        h = h + jnp.dot(h, wsq_ref[wb + 4], preferred_element_type=f32) + b_(bb + 4)
        h = _gelu(h)

    # ---- linear2: Linear(E, P) -> GELU, then mean over vertices (seq dim) ----
    o = _gelu(jnp.dot(h, w3_ref[...], preferred_element_type=f32)
              + b_(2 + 5 * 3, P))                                          # (NL, P)
    out_ref[...] = jnp.mean(o.reshape(N, L, P), axis=1)                    # (N, P)


# ----------------------------------------------------------------------------
# Parameter handling.
# ----------------------------------------------------------------------------
def init_params(key, vertex_dim, poly_dim):
    """PyTorch-shaped parameters (Linear weights are (out, in))."""
    E, P = vertex_dim, poly_dim
    shapes = {
        "lin1_w1": (E, 2), "lin1_b1": (E,),
        "lin1_w2": (E, E), "lin1_b2": (E,),
        "lin2_w": (P, E), "lin2_b": (P,),
    }
    for b in range(3):
        shapes.update({
            f"attn{b}_in_w": (3 * E, E), f"attn{b}_in_b": (3 * E,),
            f"attn{b}_out_w": (E, E), f"attn{b}_out_b": (E,),
            f"attn{b}_lin_w": (E, E), f"attn{b}_lin_b": (E,),
        })
    names = sorted(shapes)
    keys = jax.random.split(key, len(names))
    params = {}
    for k, name in zip(keys, names):
        shape = shapes[name]
        fan_in = shape[-1] if len(shape) > 1 else shape[0]
        bound = 1.0 / math.sqrt(fan_in)
        params[name] = jax.random.uniform(k, shape, jnp.float32, -bound, bound)
    return params


def pack_params(params):
    """Pack the PyTorch tensors into 4 kernel weight inputs.

    Call ONCE at model-load time (outside jit) so the transposes/stacks never
    re-run on the per-call path.  Layout:
      w1   (2, E)         : linear1[0].weight.T
      wsq  (16, E, E)     : [lin1_w2.T] + per block [wq.T, wk.T, wv.T, wo.T, wl.T]
      bias (18, max(E,P)) : [lin1_b1, lin1_b2] + per block [bq,bk,bv,bo,bl] + [lin2_b]
      w3   (E, P)         : linear2[0].weight.T
    """
    E = params["lin1_w2"].shape[0]
    P = params["lin2_w"].shape[0]
    W = max(E, P)

    def row(v):
        return jnp.pad(v, (0, W - v.shape[0]))

    sq = [params["lin1_w2"].T]
    rows = [row(params["lin1_b1"]), row(params["lin1_b2"])]
    for b in range(3):
        in_w = params[f"attn{b}_in_w"]      # (3E, E), rows = [q; k; v]
        in_b = params[f"attn{b}_in_b"]      # (3E,)
        sq += [in_w[:E].T, in_w[E:2 * E].T, in_w[2 * E:].T,
               params[f"attn{b}_out_w"].T, params[f"attn{b}_lin_w"].T]
        rows += [row(in_b[:E]), row(in_b[E:2 * E]), row(in_b[2 * E:]),
                 row(params[f"attn{b}_out_b"]), row(params[f"attn{b}_lin_b"])]
    rows.append(row(params["lin2_b"]))

    w1 = params["lin1_w1"].T.astype(jnp.float32)       # (2, E)
    wsq = jnp.stack(sq).astype(jnp.float32)            # (16, E, E)
    bias = jnp.stack(rows).astype(jnp.float32)         # (18, W)
    w3 = params["lin2_w"].T.astype(jnp.float32)        # (E, P)
    return w1, wsq, bias, w3


# ----------------------------------------------------------------------------
# Pallas call wrapper (only x-flattening happens per call).
# ----------------------------------------------------------------------------
def polygon_transformer_forward(x, packed, num_heads):
    """x: (L, N, 2) float32 (seq-first, as in PyTorch).  Returns (N, poly_dim)."""
    w1, wsq, bias, w3 = packed
    L, N, _ = x.shape
    E = wsq.shape[-1]
    P = w3.shape[-1]
    head_dim = E // num_heads
    NL, NH = N * L, N * num_heads

    x_k = jnp.transpose(x, (1, 0, 2)).reshape(NL, 2).astype(jnp.float32)

    flops = (
        2 * NL * 2 * E + 2 * NL * E * E                       # linear1
        + 3 * (3 * 2 * NL * E * E                             # q, k, v projections
               + 2 * 2 * NH * L * L * E                       # scores + context
               + 2 * 2 * NL * E * E)                          # out-proj + linear
        + 2 * NL * E * P)                                      # linear2
    transcendentals = (
        2 * NL * E                                             # tanh + gelu (linear1)
        + 3 * (NH * L * L + NH * L + NL * E)                   # exp, recip, gelu / blk
        + NL * P)                                              # gelu (linear2)
    bytes_accessed = 4 * (x_k.size + w1.size + wsq.size + bias.size + w3.size + N * P)

    kernel = functools.partial(_kernel, N=N, L=L, E=E, P=P,
                               num_heads=num_heads, head_dim=head_dim)
    vmem = pl.BlockSpec(memory_space=pltpu.MemorySpace.VMEM)
    return pl.pallas_call(
        kernel,
        out_shape=jax.ShapeDtypeStruct((N, P), jnp.float32),
        in_specs=[vmem] * 5,
        out_specs=vmem,
        cost_estimate=pl.CostEstimate(flops=flops,
                                      transcendentals=transcendentals,
                                      bytes_accessed=bytes_accessed),
    )(x_k, w1, wsq, bias, w3)


# ----------------------------------------------------------------------------
# Pure-JAX reference mirroring the PyTorch module (for validation).
# ----------------------------------------------------------------------------
def reference_forward(x, params, num_heads):
    E = params["lin1_w2"].shape[0]
    hd = E // num_heads
    L, N, _ = x.shape
    h = jnp.tanh(x @ params["lin1_w1"].T + params["lin1_b1"])
    h = jax.nn.gelu(h @ params["lin1_w2"].T + params["lin1_b2"], approximate=False)
    for b in range(3):
        in_w, in_b = params[f"attn{b}_in_w"], params[f"attn{b}_in_b"]
        q = h @ in_w[:E].T + in_b[:E]
        k = h @ in_w[E:2 * E].T + in_b[E:2 * E]
        v = h @ in_w[2 * E:].T + in_b[2 * E:]
        qh = q.reshape(L, N, num_heads, hd).transpose(1, 2, 0, 3) / math.sqrt(hd)
        kh = k.reshape(L, N, num_heads, hd).transpose(1, 2, 0, 3)
        vh = v.reshape(L, N, num_heads, hd).transpose(1, 2, 0, 3)
        s = jnp.einsum("bhld,bhmd->bhlm", qh, kh)
        probs = jax.nn.softmax(s, axis=-1)
        ctx = jnp.einsum("bhlm,bhmd->bhld", probs, vh)           # (N, H, L, hd)
        ctx = ctx.transpose(2, 0, 1, 3).reshape(L, N, E)
        h = h + ctx @ params[f"attn{b}_out_w"].T + params[f"attn{b}_out_b"]
        h = h + h @ params[f"attn{b}_lin_w"].T + params[f"attn{b}_lin_b"]
        h = jax.nn.gelu(h, approximate=False)
    o = jax.nn.gelu(h @ params["lin2_w"].T + params["lin2_b"], approximate=False)
    return o.mean(axis=0)


# ----------------------------------------------------------------------------
if __name__ == "__main__":
    VERTEX_DIM, NUM_HEADS, POLY_DIM = 32, 4, 16
    L, N = 8, 2                          # polygon vertices (seq), batch

    key = jax.random.PRNGKey(0)
    kx, kparams = jax.random.split(key)
    x = jax.random.normal(kx, (L, N, 2), jnp.float32)
    params = init_params(kparams, VERTEX_DIM, POLY_DIM)

    packed = pack_params(params)          # once, at model-load time (outside jit)
    fwd = jax.jit(functools.partial(polygon_transformer_forward, num_heads=NUM_HEADS))
    out = jax.block_until_ready(fwd(x, packed))

    ref = reference_forward(x, params, NUM_HEADS)
    assert out.shape == (N, POLY_DIM), out.shape
    # Tolerance covers the tanh-approx GELU (~3e-4/call) stacked on the
    # approximate (EUP) softmax reciprocal; the reference keeps PyTorch's exact
    # erf GELU / exact softmax semantics.
    assert jnp.allclose(out, ref, atol=5e-3, rtol=5e-3), (out, ref)
    print("KERNEL_OK")
</pallas_src>

<mosaic_0001>
module attributes {stable_mosaic.version = 11 : i64} {
  func.func @_kernel(%arg0: memref<16x2xf32, #tpu.memory_space<vmem>>, %arg1: memref<2x32xf32, #tpu.memory_space<vmem>>, %arg2: memref<16x32x32xf32, #tpu.memory_space<vmem>>, %arg3: memref<18x32xf32, #tpu.memory_space<vmem>>, %arg4: memref<32x16xf32, #tpu.memory_space<vmem>>, %arg5: memref<2x16xf32, #tpu.memory_space<vmem>>) attributes {dimension_semantics = [], scalar_prefetch = 0 : i64, scratch_operands = 0 : i64, tpu.core_type = #tpu.core_type<tc>} {
    %c0 = arith.constant 0 : index
    %c0_0 = arith.constant 0 : index
    %0 = vector.load %arg0[%c0, %c0_0] : memref<16x2xf32, #tpu.memory_space<vmem>>, vector<16x1xf32>
    %c0_1 = arith.constant 0 : index
    %c0_2 = arith.constant 0 : index
    %1 = vector.load %arg1[%c0_1, %c0_2] : memref<2x32xf32, #tpu.memory_space<vmem>>, vector<1x32xf32>
    %2 = vector.broadcast %0 : vector<16x1xf32> to vector<16x32xf32>
    %3 = vector.broadcast %1 : vector<1x32xf32> to vector<16x32xf32>
    %4 = arith.mulf %2, %3 : vector<16x32xf32>
    %c0_3 = arith.constant 0 : index
    %c1 = arith.constant 1 : index
    %5 = vector.load %arg0[%c0_3, %c1] : memref<16x2xf32, #tpu.memory_space<vmem>>, vector<16x1xf32>
    %c1_4 = arith.constant 1 : index
    %c0_5 = arith.constant 0 : index
    %6 = vector.load %arg1[%c1_4, %c0_5] : memref<2x32xf32, #tpu.memory_space<vmem>>, vector<1x32xf32>
    %7 = vector.broadcast %5 : vector<16x1xf32> to vector<16x32xf32>
    %8 = vector.broadcast %6 : vector<1x32xf32> to vector<16x32xf32>
    %9 = arith.mulf %7, %8 : vector<16x32xf32>
    %10 = arith.addf %4, %9 : vector<16x32xf32>
    %c0_6 = arith.constant 0 : index
    %c0_7 = arith.constant 0 : index
    %11 = vector.load %arg3[%c0_6, %c0_7] : memref<18x32xf32, #tpu.memory_space<vmem>>, vector<1x32xf32>
    %12 = vector.broadcast %11 : vector<1x32xf32> to vector<16x32xf32>
    %13 = arith.addf %10, %12 : vector<16x32xf32>
    %14 = math.tanh %13 : vector<16x32xf32>
    %c0_8 = arith.constant 0 : index
    %c0_9 = arith.constant 0 : index
    %c0_10 = arith.constant 0 : index
    %15 = vector.load %arg2[%c0_8, %c0_9, %c0_10] : memref<16x32x32xf32, #tpu.memory_space<vmem>>, vector<1x32x32xf32>
    %16 = vector.shape_cast %15 : vector<1x32x32xf32> to vector<32x32xf32>
    %cst = arith.constant dense<0.000000e+00> : vector<16x32xf32>
    %17 = tpu.matmul %14, %16, %cst {dimension_numbers = #tpu.dot_dimension_numbers<[1], [0], [0], [1], [0, 0, 1, 1], [], []>} : vector<16x32xf32>, vector<32x32xf32>, vector<16x32xf32> -> vector<16x32xf32>
    %c1_11 = arith.constant 1 : index
    %c0_12 = arith.constant 0 : index
    %18 = vector.load %arg3[%c1_11, %c0_12] : memref<18x32xf32, #tpu.memory_space<vmem>>, vector<1x32xf32>
    %19 = vector.broadcast %18 : vector<1x32xf32> to vector<16x32xf32>
    %20 = arith.addf %17, %19 : vector<16x32xf32>
    %cst_13 = arith.constant 5.000000e-01 : f32
    %21 = vector.broadcast %cst_13 : f32 to vector<16x32xf32>
    %22 = arith.mulf %21, %20 : vector<16x32xf32>
    %cst_14 = arith.constant 4.471500e-02 : f32
    %23 = vector.broadcast %cst_14 : f32 to vector<16x32xf32>
    %24 = arith.mulf %23, %20 : vector<16x32xf32>
    %25 = arith.mulf %24, %20 : vector<16x32xf32>
    %26 = arith.mulf %25, %20 : vector<16x32xf32>
    %27 = arith.addf %20, %26 : vector<16x32xf32>
    %cst_15 = arith.constant 0.797884583 : f32
    %28 = vector.broadcast %cst_15 : f32 to vector<16x32xf32>
    %29 = arith.mulf %28, %27 : vector<16x32xf32>
    %30 = math.tanh %29 : vector<16x32xf32>
    %cst_16 = arith.constant 1.000000e+00 : f32
    %31 = vector.broadcast %cst_16 : f32 to vector<16x32xf32>
    %32 = arith.addf %31, %30 : vector<16x32xf32>
    %33 = arith.mulf %22, %32 : vector<16x32xf32>
    %34 = tpu.iota {dimensions = array<i32: 1>} : vector<4x32xi32>
    %35 = tpu.iota {dimensions = array<i32: 0>} : vector<4x32xi32>
    %c8_i32 = arith.constant 8 : i32
    %36 = vector.broadcast %c8_i32 : i32 to vector<4x32xi32>
    %37 = arith.muli %35, %36 : vector<4x32xi32>
    %38 = arith.cmpi sge, %34, %37 : vector<4x32xi32>
    %c8_i32_17 = arith.constant 8 : i32
    %39 = vector.broadcast %c8_i32_17 : i32 to vector<4x32xi32>
    %40 = arith.addi %37, %39 : vector<4x32xi32>
    %41 = arith.cmpi slt, %34, %40 : vector<4x32xi32>
    %42 = arith.andi %38, %41 : vector<4x32xi1>
    %cst_18 = arith.constant 1.000000e+00 : f32
    %cst_19 = arith.constant 0.000000e+00 : f32
    %43 = vector.broadcast %cst_18 : f32 to vector<4x32xf32>
    %44 = vector.broadcast %cst_19 : f32 to vector<4x32xf32>
    %45 = arith.select %42, %43, %44 : vector<4x32xi1>, vector<4x32xf32>
    %cst_20 = arith.constant 0.353553385 : f32
    %46 = vector.broadcast %cst_20 : f32 to vector<4x32xf32>
    %47 = arith.mulf %46, %45 : vector<4x32xf32>
    %48 = vector.shape_cast %47 : vector<4x32xf32> to vector<1x4x1x32xf32>
    %49 = vector.shape_cast %45 : vector<4x32xf32> to vector<1x4x1x32xf32>
    %c1_21 = arith.constant 1 : index
    %c0_22 = arith.constant 0 : index
    %c0_23 = arith.constant 0 : index
    %50 = vector.load %arg2[%c1_21, %c0_22, %c0_23] : memref<16x32x32xf32, #tpu.memory_space<vmem>>, vector<1x32x32xf32>
    %51 = vector.shape_cast %50 : vector<1x32x32xf32> to vector<32x32xf32>
    %cst_24 = arith.constant dense<0.000000e+00> : vector<16x32xf32>
    %52 = tpu.matmul %33, %51, %cst_24 {dimension_numbers = #tpu.dot_dimension_numbers<[1], [0], [0], [1], [0, 0, 1, 1], [], []>} : vector<16x32xf32>, vector<32x32xf32>, vector<16x32xf32> -> vector<16x32xf32>
    %c2 = arith.constant 2 : index
    %c0_25 = arith.constant 0 : index
    %53 = vector.load %arg3[%c2, %c0_25] : memref<18x32xf32, #tpu.memory_space<vmem>>, vector<1x32xf32>
    %54 = vector.broadcast %53 : vector<1x32xf32> to vector<16x32xf32>
    %55 = arith.addf %52, %54 : vector<16x32xf32>
    %c2_26 = arith.constant 2 : index
    %c0_27 = arith.constant 0 : index
    %c0_28 = arith.constant 0 : index
    %56 = vector.load %arg2[%c2_26, %c0_27, %c0_28] : memref<16x32x32xf32, #tpu.memory_space<vmem>>, vector<1x32x32xf32>
    %57 = vector.shape_cast %56 : vector<1x32x32xf32> to vector<32x32xf32>
    %cst_29 = arith.constant dense<0.000000e+00> : vector<16x32xf32>
    %58 = tpu.matmul %33, %57, %cst_29 {dimension_numbers = #tpu.dot_dimension_numbers<[1], [0], [0], [1], [0, 0, 1, 1], [], []>} : vector<16x32xf32>, vector<32x32xf32>, vector<16x32xf32> -> vector<16x32xf32>
    %c3 = arith.constant 3 : index
    %c0_30 = arith.constant 0 : index
    %59 = vector.load %arg3[%c3, %c0_30] : memref<18x32xf32, #tpu.memory_space<vmem>>, vector<1x32xf32>
    %60 = vector.broadcast %59 : vector<1x32xf32> to vector<16x32xf32>
    %61 = arith.addf %58, %60 : vector<16x32xf32>
    %c3_31 = arith.constant 3 : index
    %c0_32 = arith.constant 0 : index
    %c0_33 = arith.constant 0 : index
    %62 = vector.load %arg2[%c3_31, %c0_32, %c0_33] : memref<16x32x32xf32, #tpu.memory_space<vmem>>, vector<1x32x32xf32>
    %63 = vector.shape_cast %62 : vector<1x32x32xf32> to vector<32x32xf32>
    %cst_34 = arith.constant dense<0.000000e+00> : vector<16x32xf32>
    %64 = tpu.matmul %33, %63, %cst_34 {dimension_numbers = #tpu.dot_dimension_numbers<[1], [0], [0], [1], [0, 0, 1, 1], [], []>} : vector<16x32xf32>, vector<32x32xf32>, vector<16x32xf32> -> vector<16x32xf32>
    %c4 = arith.constant 4 : index
    %c0_35 = arith.constant 0 : index
    %65 = vector.load %arg3[%c4, %c0_35] : memref<18x32xf32, #tpu.memory_space<vmem>>, vector<1x32xf32>
    %66 = vector.broadcast %65 : vector<1x32xf32> to vector<16x32xf32>
    %67 = arith.addf %64, %66 : vector<16x32xf32>
    %68 = vector.shape_cast %55 : vector<16x32xf32> to vector<2x1x8x32xf32>
    %69 = vector.broadcast %68 : vector<2x1x8x32xf32> to vector<2x4x8x32xf32>
    %70 = vector.broadcast %48 : vector<1x4x1x32xf32> to vector<2x4x8x32xf32>
    %71 = arith.mulf %69, %70 : vector<2x4x8x32xf32>
    %72 = vector.shape_cast %71 : vector<2x4x8x32xf32> to vector<8x8x32xf32>
    %73 = vector.shape_cast %61 : vector<16x32xf32> to vector<2x1x8x32xf32>
    %74 = vector.shape_cast %73 : vector<2x1x8x32xf32> to vector<2x1x8x32xf32>
    %75 = vector.broadcast %74 : vector<2x1x8x32xf32> to vector<2x4x8x32xf32>
    %76 = vector.shape_cast %75 : vector<2x4x8x32xf32> to vector<8x8x32xf32>
    %77 = vector.shape_cast %67 : vector<16x32xf32> to vector<2x1x8x32xf32>
    %78 = vector.broadcast %77 : vector<2x1x8x32xf32> to vector<2x4x8x32xf32>
    %79 = vector.broadcast %49 : vector<1x4x1x32xf32> to vector<2x4x8x32xf32>
    %80 = arith.mulf %78, %79 : vector<2x4x8x32xf32>
    %81 = vector.shape_cast %80 : vector<2x4x8x32xf32> to vector<8x8x32xf32>
    "tpu.trace_start"() <{level = 10 : i32, message = "ble,bme->blm"}> : () -> ()
    %cst_36 = arith.constant dense<0.000000e+00> : vector<8x8x8xf32>
    %82 = tpu.matmul %72, %76, %cst_36 {dimension_numbers = #tpu.dot_dimension_numbers<[2], [2], [1], [1], [0, 0, 0, 1, 1, 1], [0], [0]>} : vector<8x8x32xf32>, vector<8x8x32xf32>, vector<8x8x8xf32> -> vector<8x8x8xf32>
    "tpu.trace_stop"() : () -> ()
    %cst_37 = arith.constant dense<0xFF800000> : vector<8x8xf32>
    %83 = vector.multi_reduction <maximumf>, %82, %cst_37 [2] : vector<8x8x8xf32> to vector<8x8xf32>
    %84 = vector.shape_cast %83 : vector<8x8xf32> to vector<8x8x1xf32>
    %85 = vector.broadcast %84 : vector<8x8x1xf32> to vector<8x8x8xf32>
    %86 = arith.subf %82, %85 : vector<8x8x8xf32>
    %87 = math.exp %86 : vector<8x8x8xf32>
    %cst_38 = arith.constant dense<0.000000e+00> : vector<8x8xf32>
    %88 = vector.multi_reduction <add>, %87, %cst_38 [2] : vector<8x8x8xf32> to vector<8x8xf32>
    %89 = vector.shape_cast %88 : vector<8x8xf32> to vector<8x8x1xf32>
    %90 = tpu.reciprocal %89 {approx = true} : vector<8x8x1xf32> -> vector<8x8x1xf32>
    %91 = vector.broadcast %90 : vector<8x8x1xf32> to vector<8x8x8xf32>
    %92 = arith.mulf %87, %91 : vector<8x8x8xf32>
    "tpu.trace_start"() <{level = 10 : i32, message = "blm,bme->ble"}> : () -> ()
    %cst_39 = arith.constant dense<0.000000e+00> : vector<8x8x32xf32>
    %93 = tpu.matmul %92, %81, %cst_39 {dimension_numbers = #tpu.dot_dimension_numbers<[2], [1], [1], [2], [0, 0, 0, 1, 1, 2], [0], [0]>} : vector<8x8x8xf32>, vector<8x8x32xf32>, vector<8x8x32xf32> -> vector<8x8x32xf32>
    "tpu.trace_stop"() : () -> ()
    %94 = vector.shape_cast %93 : vector<8x8x32xf32> to vector<2x4x8x32xf32>
    %95 = vector.extract_strided_slice %94 {offsets = [0, 0, 0, 0], sizes = [2, 1, 8, 32], strides = [1, 1, 1, 1]} : vector<2x4x8x32xf32> to vector<2x1x8x32xf32>
    %96 = vector.shape_cast %95 : vector<2x1x8x32xf32> to vector<2x8x32xf32>
    %97 = vector.extract_strided_slice %94 {offsets = [0, 1, 0, 0], sizes = [2, 1, 8, 32], strides = [1, 1, 1, 1]} : vector<2x4x8x32xf32> to vector<2x1x8x32xf32>
    %98 = vector.shape_cast %97 : vector<2x1x8x32xf32> to vector<2x8x32xf32>
    %99 = arith.addf %96, %98 : vector<2x8x32xf32>
    %100 = vector.extract_strided_slice %94 {offsets = [0, 2, 0, 0], sizes = [2, 1, 8, 32], strides = [1, 1, 1, 1]} : vector<2x4x8x32xf32> to vector<2x1x8x32xf32>
    %101 = vector.shape_cast %100 : vector<2x1x8x32xf32> to vector<2x8x32xf32>
    %102 = arith.addf %99, %101 : vector<2x8x32xf32>
    %103 = vector.extract_strided_slice %94 {offsets = [0, 3, 0, 0], sizes = [2, 1, 8, 32], strides = [1, 1, 1, 1]} : vector<2x4x8x32xf32> to vector<2x1x8x32xf32>
    %104 = vector.shape_cast %103 : vector<2x1x8x32xf32> to vector<2x8x32xf32>
    %105 = arith.addf %102, %104 : vector<2x8x32xf32>
    %106 = vector.shape_cast %105 : vector<2x8x32xf32> to vector<16x32xf32>
    %c4_40 = arith.constant 4 : index
    %c0_41 = arith.constant 0 : index
    %c0_42 = arith.constant 0 : index
    %107 = vector.load %arg2[%c4_40, %c0_41, %c0_42] : memref<16x32x32xf32, #tpu.memory_space<vmem>>, vector<1x32x32xf32>
    %108 = vector.shape_cast %107 : vector<1x32x32xf32> to vector<32x32xf32>
    %cst_43 = arith.constant dense<0.000000e+00> : vector<16x32xf32>
    %109 = tpu.matmul %106, %108, %cst_43 {dimension_numbers = #tpu.dot_dimension_numbers<[1], [0], [0], [1], [0, 0, 1, 1], [], []>} : vector<16x32xf32>, vector<32x32xf32>, vector<16x32xf32> -> vector<16x32xf32>
    %110 = arith.addf %33, %109 : vector<16x32xf32>
    %c5 = arith.constant 5 : index
    %c0_44 = arith.constant 0 : index
    %111 = vector.load %arg3[%c5, %c0_44] : memref<18x32xf32, #tpu.memory_space<vmem>>, vector<1x32xf32>
    %112 = vector.broadcast %111 : vector<1x32xf32> to vector<16x32xf32>
    %113 = arith.addf %110, %112 : vector<16x32xf32>
    %c5_45 = arith.constant 5 : index
    %c0_46 = arith.constant 0 : index
    %c0_47 = arith.constant 0 : index
    %114 = vector.load %arg2[%c5_45, %c0_46, %c0_47] : memref<16x32x32xf32, #tpu.memory_space<vmem>>, vector<1x32x32xf32>
    %115 = vector.shape_cast %114 : vector<1x32x32xf32> to vector<32x32xf32>
    %cst_48 = arith.constant dense<0.000000e+00> : vector<16x32xf32>
    %116 = tpu.matmul %113, %115, %cst_48 {dimension_numbers = #tpu.dot_dimension_numbers<[1], [0], [0], [1], [0, 0, 1, 1], [], []>} : vector<16x32xf32>, vector<32x32xf32>, vector<16x32xf32> -> vector<16x32xf32>
    %117 = arith.addf %113, %116 : vector<16x32xf32>
    %c6 = arith.constant 6 : index
    %c0_49 = arith.constant 0 : index
    %118 = vector.load %arg3[%c6, %c0_49] : memref<18x32xf32, #tpu.memory_space<vmem>>, vector<1x32xf32>
    %119 = vector.broadcast %118 : vector<1x32xf32> to vector<16x32xf32>
    %120 = arith.addf %117, %119 : vector<16x32xf32>
    %cst_50 = arith.constant 5.000000e-01 : f32
    %121 = vector.broadcast %cst_50 : f32 to vector<16x32xf32>
    %122 = arith.mulf %121, %120 : vector<16x32xf32>
    %cst_51 = arith.constant 4.471500e-02 : f32
    %123 = vector.broadcast %cst_51 : f32 to vector<16x32xf32>
    %124 = arith.mulf %123, %120 : vector<16x32xf32>
    %125 = arith.mulf %124, %120 : vector<16x32xf32>
    %126 = arith.mulf %125, %120 : vector<16x32xf32>
    %127 = arith.addf %120, %126 : vector<16x32xf32>
    %cst_52 = arith.constant 0.797884583 : f32
    %128 = vector.broadcast %cst_52 : f32 to vector<16x32xf32>
    %129 = arith.mulf %128, %127 : vector<16x32xf32>
    %130 = math.tanh %129 : vector<16x32xf32>
    %cst_53 = arith.constant 1.000000e+00 : f32
    %131 = vector.broadcast %cst_53 : f32 to vector<16x32xf32>
    %132 = arith.addf %131, %130 : vector<16x32xf32>
    %133 = arith.mulf %122, %132 : vector<16x32xf32>
    %c6_54 = arith.constant 6 : index
    %c0_55 = arith.constant 0 : index
    %c0_56 = arith.constant 0 : index
    %134 = vector.load %arg2[%c6_54, %c0_55, %c0_56] : memref<16x32x32xf32, #tpu.memory_space<vmem>>, vector<1x32x32xf32>
    %135 = vector.shape_cast %134 : vector<1x32x32xf32> to vector<32x32xf32>
    %cst_57 = arith.constant dense<0.000000e+00> : vector<16x32xf32>
    %136 = tpu.matmul %133, %135, %cst_57 {dimension_numbers = #tpu.dot_dimension_numbers<[1], [0], [0], [1], [0, 0, 1, 1], [], []>} : vector<16x32xf32>, vector<32x32xf32>, vector<16x32xf32> -> vector<16x32xf32>
    %c7 = arith.constant 7 : index
    %c0_58 = arith.constant 0 : index
    %137 = vector.load %arg3[%c7, %c0_58] : memref<18x32xf32, #tpu.memory_space<vmem>>, vector<1x32xf32>
    %138 = vector.broadcast %137 : vector<1x32xf32> to vector<16x32xf32>
    %139 = arith.addf %136, %138 : vector<16x32xf32>
    %c7_59 = arith.constant 7 : index
    %c0_60 = arith.constant 0 : index
    %c0_61 = arith.constant 0 : index
    %140 = vector.load %arg2[%c7_59, %c0_60, %c0_61] : memref<16x32x32xf32, #tpu.memory_space<vmem>>, vector<1x32x32xf32>
    %141 = vector.shape_cast %140 : vector<1x32x32xf32> to vector<32x32xf32>
    %cst_62 = arith.constant dense<0.000000e+00> : vector<16x32xf32>
    %142 = tpu.matmul %133, %141, %cst_62 {dimension_numbers = #tpu.dot_dimension_numbers<[1], [0], [0], [1], [0, 0, 1, 1], [], []>} : vector<16x32xf32>, vector<32x32xf32>, vector<16x32xf32> -> vector<16x32xf32>
    %c8 = arith.constant 8 : index
    %c0_63 = arith.constant 0 : index
    %143 = vector.load %arg3[%c8, %c0_63] : memref<18x32xf32, #tpu.memory_space<vmem>>, vector<1x32xf32>
    %144 = vector.broadcast %143 : vector<1x32xf32> to vector<16x32xf32>
    %145 = arith.addf %142, %144 : vector<16x32xf32>
    %c8_64 = arith.constant 8 : index
    %c0_65 = arith.constant 0 : index
    %c0_66 = arith.constant 0 : index
    %146 = vector.load %arg2[%c8_64, %c0_65, %c0_66] : memref<16x32x32xf32, #tpu.memory_space<vmem>>, vector<1x32x32xf32>
    %147 = vector.shape_cast %146 : vector<1x32x32xf32> to vector<32x32xf32>
    %cst_67 = arith.constant dense<0.000000e+00> : vector<16x32xf32>
    %148 = tpu.matmul %133, %147, %cst_67 {dimension_numbers = #tpu.dot_dimension_numbers<[1], [0], [0], [1], [0, 0, 1, 1], [], []>} : vector<16x32xf32>, vector<32x32xf32>, vector<16x32xf32> -> vector<16x32xf32>
    %c9 = arith.constant 9 : index
    %c0_68 = arith.constant 0 : index
    %149 = vector.load %arg3[%c9, %c0_68] : memref<18x32xf32, #tpu.memory_space<vmem>>, vector<1x32xf32>
    %150 = vector.broadcast %149 : vector<1x32xf32> to vector<16x32xf32>
    %151 = arith.addf %148, %150 : vector<16x32xf32>
    %152 = vector.shape_cast %139 : vector<16x32xf32> to vector<2x1x8x32xf32>
    %153 = vector.broadcast %152 : vector<2x1x8x32xf32> to vector<2x4x8x32xf32>
    %154 = vector.broadcast %48 : vector<1x4x1x32xf32> to vector<2x4x8x32xf32>
    %155 = arith.mulf %153, %154 : vector<2x4x8x32xf32>
    %156 = vector.shape_cast %155 : vector<2x4x8x32xf32> to vector<8x8x32xf32>
    %157 = vector.shape_cast %145 : vector<16x32xf32> to vector<2x1x8x32xf32>
    %158 = vector.shape_cast %157 : vector<2x1x8x32xf32> to vector<2x1x8x32xf32>
    %159 = vector.broadcast %158 : vector<2x1x8x32xf32> to vector<2x4x8x32xf32>
    %160 = vector.shape_cast %159 : vector<2x4x8x32xf32> to vector<8x8x32xf32>
    %161 = vector.shape_cast %151 : vector<16x32xf32> to vector<2x1x8x32xf32>
    %162 = vector.broadcast %161 : vector<2x1x8x32xf32> to vector<2x4x8x32xf32>
    %163 = vector.broadcast %49 : vector<1x4x1x32xf32> to vector<2x4x8x32xf32>
    %164 = arith.mulf %162, %163 : vector<2x4x8x32xf32>
    %165 = vector.shape_cast %164 : vector<2x4x8x32xf32> to vector<8x8x32xf32>
    "tpu.trace_start"() <{level = 10 : i32, message = "ble,bme->blm"}> : () -> ()
    %cst_69 = arith.constant dense<0.000000e+00> : vector<8x8x8xf32>
    %166 = tpu.matmul %156, %160, %cst_69 {dimension_numbers = #tpu.dot_dimension_numbers<[2], [2], [1], [1], [0, 0, 0, 1, 1, 1], [0], [0]>} : vector<8x8x32xf32>, vector<8x8x32xf32>, vector<8x8x8xf32> -> vector<8x8x8xf32>
    "tpu.trace_stop"() : () -> ()
    %cst_70 = arith.constant dense<0xFF800000> : vector<8x8xf32>
    %167 = vector.multi_reduction <maximumf>, %166, %cst_70 [2] : vector<8x8x8xf32> to vector<8x8xf32>
    %168 = vector.shape_cast %167 : vector<8x8xf32> to vector<8x8x1xf32>
    %169 = vector.broadcast %168 : vector<8x8x1xf32> to vector<8x8x8xf32>
    %170 = arith.subf %166, %169 : vector<8x8x8xf32>
    %171 = math.exp %170 : vector<8x8x8xf32>
    %cst_71 = arith.constant dense<0.000000e+00> : vector<8x8xf32>
    %172 = vector.multi_reduction <add>, %171, %cst_71 [2] : vector<8x8x8xf32> to vector<8x8xf32>
    %173 = vector.shape_cast %172 : vector<8x8xf32> to vector<8x8x1xf32>
    %174 = tpu.reciprocal %173 {approx = true} : vector<8x8x1xf32> -> vector<8x8x1xf32>
    %175 = vector.broadcast %174 : vector<8x8x1xf32> to vector<8x8x8xf32>
    %176 = arith.mulf %171, %175 : vector<8x8x8xf32>
    "tpu.trace_start"() <{level = 10 : i32, message = "blm,bme->ble"}> : () -> ()
    %cst_72 = arith.constant dense<0.000000e+00> : vector<8x8x32xf32>
    %177 = tpu.matmul %176, %165, %cst_72 {dimension_numbers = #tpu.dot_dimension_numbers<[2], [1], [1], [2], [0, 0, 0, 1, 1, 2], [0], [0]>} : vector<8x8x8xf32>, vector<8x8x32xf32>, vector<8x8x32xf32> -> vector<8x8x32xf32>
    "tpu.trace_stop"() : () -> ()
    %178 = vector.shape_cast %177 : vector<8x8x32xf32> to vector<2x4x8x32xf32>
    %179 = vector.extract_strided_slice %178 {offsets = [0, 0, 0, 0], sizes = [2, 1, 8, 32], strides = [1, 1, 1, 1]} : vector<2x4x8x32xf32> to vector<2x1x8x32xf32>
    %180 = vector.shape_cast %179 : vector<2x1x8x32xf32> to vector<2x8x32xf32>
    %181 = vector.extract_strided_slice %178 {offsets = [0, 1, 0, 0], sizes = [2, 1, 8, 32], strides = [1, 1, 1, 1]} : vector<2x4x8x32xf32> to vector<2x1x8x32xf32>
    %182 = vector.shape_cast %181 : vector<2x1x8x32xf32> to vector<2x8x32xf32>
    %183 = arith.addf %180, %182 : vector<2x8x32xf32>
    %184 = vector.extract_strided_slice %178 {offsets = [0, 2, 0, 0], sizes = [2, 1, 8, 32], strides = [1, 1, 1, 1]} : vector<2x4x8x32xf32> to vector<2x1x8x32xf32>
    %185 = vector.shape_cast %184 : vector<2x1x8x32xf32> to vector<2x8x32xf32>
    %186 = arith.addf %183, %185 : vector<2x8x32xf32>
    %187 = vector.extract_strided_slice %178 {offsets = [0, 3, 0, 0], sizes = [2, 1, 8, 32], strides = [1, 1, 1, 1]} : vector<2x4x8x32xf32> to vector<2x1x8x32xf32>
    %188 = vector.shape_cast %187 : vector<2x1x8x32xf32> to vector<2x8x32xf32>
    %189 = arith.addf %186, %188 : vector<2x8x32xf32>
    %190 = vector.shape_cast %189 : vector<2x8x32xf32> to vector<16x32xf32>
    %c9_73 = arith.constant 9 : index
    %c0_74 = arith.constant 0 : index
    %c0_75 = arith.constant 0 : index
    %191 = vector.load %arg2[%c9_73, %c0_74, %c0_75] : memref<16x32x32xf32, #tpu.memory_space<vmem>>, vector<1x32x32xf32>
    %192 = vector.shape_cast %191 : vector<1x32x32xf32> to vector<32x32xf32>
    %cst_76 = arith.constant dense<0.000000e+00> : vector<16x32xf32>
    %193 = tpu.matmul %190, %192, %cst_76 {dimension_numbers = #tpu.dot_dimension_numbers<[1], [0], [0], [1], [0, 0, 1, 1], [], []>} : vector<16x32xf32>, vector<32x32xf32>, vector<16x32xf32> -> vector<16x32xf32>
    %194 = arith.addf %133, %193 : vector<16x32xf32>
    %c10 = arith.constant 10 : index
    %c0_77 = arith.constant 0 : index
    %195 = vector.load %arg3[%c10, %c0_77] : memref<18x32xf32, #tpu.memory_space<vmem>>, vector<1x32xf32>
    %196 = vector.broadcast %195 : vector<1x32xf32> to vector<16x32xf32>
    %197 = arith.addf %194, %196 : vector<16x32xf32>
    %c10_78 = arith.constant 10 : index
    %c0_79 = arith.constant 0 : index
    %c0_80 = arith.constant 0 : index
    %198 = vector.load %arg2[%c10_78, %c0_79, %c0_80] : memref<16x32x32xf32, #tpu.memory_space<vmem>>, vector<1x32x32xf32>
    %199 = vector.shape_cast %198 : vector<1x32x32xf32> to vector<32x32xf32>
    %cst_81 = arith.constant dense<0.000000e+00> : vector<16x32xf32>
    %200 = tpu.matmul %197, %199, %cst_81 {dimension_numbers = #tpu.dot_dimension_numbers<[1], [0], [0], [1], [0, 0, 1, 1], [], []>} : vector<16x32xf32>, vector<32x32xf32>, vector<16x32xf32> -> vector<16x32xf32>
    %201 = arith.addf %197, %200 : vector<16x32xf32>
    %c11 = arith.constant 11 : index
    %c0_82 = arith.constant 0 : index
    %202 = vector.load %arg3[%c11, %c0_82] : memref<18x32xf32, #tpu.memory_space<vmem>>, vector<1x32xf32>
    %203 = vector.broadcast %202 : vector<1x32xf32> to vector<16x32xf32>
    %204 = arith.addf %201, %203 : vector<16x32xf32>
    %cst_83 = arith.constant 5.000000e-01 : f32
    %205 = vector.broadcast %cst_83 : f32 to vector<16x32xf32>
    %206 = arith.mulf %205, %204 : vector<16x32xf32>
    %cst_84 = arith.constant 4.471500e-02 : f32
    %207 = vector.broadcast %cst_84 : f32 to vector<16x32xf32>
    %208 = arith.mulf %207, %204 : vector<16x32xf32>
    %209 = arith.mulf %208, %204 : vector<16x32xf32>
    %210 = arith.mulf %209, %204 : vector<16x32xf32>
    %211 = arith.addf %204, %210 : vector<16x32xf32>
    %cst_85 = arith.constant 0.797884583 : f32
    %212 = vector.broadcast %cst_85 : f32 to vector<16x32xf32>
    %213 = arith.mulf %212, %211 : vector<16x32xf32>
    %214 = math.tanh %213 : vector<16x32xf32>
    %cst_86 = arith.constant 1.000000e+00 : f32
    %215 = vector.broadcast %cst_86 : f32 to vector<16x32xf32>
    %216 = arith.addf %215, %214 : vector<16x32xf32>
    %217 = arith.mulf %206, %216 : vector<16x32xf32>
    %c11_87 = arith.constant 11 : index
    %c0_88 = arith.constant 0 : index
    %c0_89 = arith.constant 0 : index
    %218 = vector.load %arg2[%c11_87, %c0_88, %c0_89] : memref<16x32x32xf32, #tpu.memory_space<vmem>>, vector<1x32x32xf32>
    %219 = vector.shape_cast %218 : vector<1x32x32xf32> to vector<32x32xf32>
    %cst_90 = arith.constant dense<0.000000e+00> : vector<16x32xf32>
    %220 = tpu.matmul %217, %219, %cst_90 {dimension_numbers = #tpu.dot_dimension_numbers<[1], [0], [0], [1], [0, 0, 1, 1], [], []>} : vector<16x32xf32>, vector<32x32xf32>, vector<16x32xf32> -> vector<16x32xf32>
    %c12 = arith.constant 12 : index
    %c0_91 = arith.constant 0 : index
    %221 = vector.load %arg3[%c12, %c0_91] : memref<18x32xf32, #tpu.memory_space<vmem>>, vector<1x32xf32>
    %222 = vector.broadcast %221 : vector<1x32xf32> to vector<16x32xf32>
    %223 = arith.addf %220, %222 : vector<16x32xf32>
    %c12_92 = arith.constant 12 : index
    %c0_93 = arith.constant 0 : index
    %c0_94 = arith.constant 0 : index
    %224 = vector.load %arg2[%c12_92, %c0_93, %c0_94] : memref<16x32x32xf32, #tpu.memory_space<vmem>>, vector<1x32x32xf32>
    %225 = vector.shape_cast %224 : vector<1x32x32xf32> to vector<32x32xf32>
    %cst_95 = arith.constant dense<0.000000e+00> : vector<16x32xf32>
    %226 = tpu.matmul %217, %225, %cst_95 {dimension_numbers = #tpu.dot_dimension_numbers<[1], [0], [0], [1], [0, 0, 1, 1], [], []>} : vector<16x32xf32>, vector<32x32xf32>, vector<16x32xf32> -> vector<16x32xf32>
    %c13 = arith.constant 13 : index
    %c0_96 = arith.constant 0 : index
    %227 = vector.load %arg3[%c13, %c0_96] : memref<18x32xf32, #tpu.memory_space<vmem>>, vector<1x32xf32>
    %228 = vector.broadcast %227 : vector<1x32xf32> to vector<16x32xf32>
    %229 = arith.addf %226, %228 : vector<16x32xf32>
    %c13_97 = arith.constant 13 : index
    %c0_98 = arith.constant 0 : index
    %c0_99 = arith.constant 0 : index
    %230 = vector.load %arg2[%c13_97, %c0_98, %c0_99] : memref<16x32x32xf32, #tpu.memory_space<vmem>>, vector<1x32x32xf32>
    %231 = vector.shape_cast %230 : vector<1x32x32xf32> to vector<32x32xf32>
    %cst_100 = arith.constant dense<0.000000e+00> : vector<16x32xf32>
    %232 = tpu.matmul %217, %231, %cst_100 {dimension_numbers = #tpu.dot_dimension_numbers<[1], [0], [0], [1], [0, 0, 1, 1], [], []>} : vector<16x32xf32>, vector<32x32xf32>, vector<16x32xf32> -> vector<16x32xf32>
    %c14 = arith.constant 14 : index
    %c0_101 = arith.constant 0 : index
    %233 = vector.load %arg3[%c14, %c0_101] : memref<18x32xf32, #tpu.memory_space<vmem>>, vector<1x32xf32>
    %234 = vector.broadcast %233 : vector<1x32xf32> to vector<16x32xf32>
    %235 = arith.addf %232, %234 : vector<16x32xf32>
    %236 = vector.shape_cast %223 : vector<16x32xf32> to vector<2x1x8x32xf32>
    %237 = vector.broadcast %236 : vector<2x1x8x32xf32> to vector<2x4x8x32xf32>
    %238 = vector.broadcast %48 : vector<1x4x1x32xf32> to vector<2x4x8x32xf32>
    %239 = arith.mulf %237, %238 : vector<2x4x8x32xf32>
    %240 = vector.shape_cast %239 : vector<2x4x8x32xf32> to vector<8x8x32xf32>
    %241 = vector.shape_cast %229 : vector<16x32xf32> to vector<2x1x8x32xf32>
    %242 = vector.shape_cast %241 : vector<2x1x8x32xf32> to vector<2x1x8x32xf32>
    %243 = vector.broadcast %242 : vector<2x1x8x32xf32> to vector<2x4x8x32xf32>
    %244 = vector.shape_cast %243 : vector<2x4x8x32xf32> to vector<8x8x32xf32>
    %245 = vector.shape_cast %235 : vector<16x32xf32> to vector<2x1x8x32xf32>
    %246 = vector.broadcast %245 : vector<2x1x8x32xf32> to vector<2x4x8x32xf32>
    %247 = vector.broadcast %49 : vector<1x4x1x32xf32> to vector<2x4x8x32xf32>
    %248 = arith.mulf %246, %247 : vector<2x4x8x32xf32>
    %249 = vector.shape_cast %248 : vector<2x4x8x32xf32> to vector<8x8x32xf32>
    "tpu.trace_start"() <{level = 10 : i32, message = "ble,bme->blm"}> : () -> ()
    %cst_102 = arith.constant dense<0.000000e+00> : vector<8x8x8xf32>
    %250 = tpu.matmul %240, %244, %cst_102 {dimension_numbers = #tpu.dot_dimension_numbers<[2], [2], [1], [1], [0, 0, 0, 1, 1, 1], [0], [0]>} : vector<8x8x32xf32>, vector<8x8x32xf32>, vector<8x8x8xf32> -> vector<8x8x8xf32>
    "tpu.trace_stop"() : () -> ()
    %cst_103 = arith.constant dense<0xFF800000> : vector<8x8xf32>
    %251 = vector.multi_reduction <maximumf>, %250, %cst_103 [2] : vector<8x8x8xf32> to vector<8x8xf32>
    %252 = vector.shape_cast %251 : vector<8x8xf32> to vector<8x8x1xf32>
    %253 = vector.broadcast %252 : vector<8x8x1xf32> to vector<8x8x8xf32>
    %254 = arith.subf %250, %253 : vector<8x8x8xf32>
    %255 = math.exp %254 : vector<8x8x8xf32>
    %cst_104 = arith.constant dense<0.000000e+00> : vector<8x8xf32>
    %256 = vector.multi_reduction <add>, %255, %cst_104 [2] : vector<8x8x8xf32> to vector<8x8xf32>
    %257 = vector.shape_cast %256 : vector<8x8xf32> to vector<8x8x1xf32>
    %258 = tpu.reciprocal %257 {approx = true} : vector<8x8x1xf32> -> vector<8x8x1xf32>
    %259 = vector.broadcast %258 : vector<8x8x1xf32> to vector<8x8x8xf32>
    %260 = arith.mulf %255, %259 : vector<8x8x8xf32>
    "tpu.trace_start"() <{level = 10 : i32, message = "blm,bme->ble"}> : () -> ()
    %cst_105 = arith.constant dense<0.000000e+00> : vector<8x8x32xf32>
    %261 = tpu.matmul %260, %249, %cst_105 {dimension_numbers = #tpu.dot_dimension_numbers<[2], [1], [1], [2], [0, 0, 0, 1, 1, 2], [0], [0]>} : vector<8x8x8xf32>, vector<8x8x32xf32>, vector<8x8x32xf32> -> vector<8x8x32xf32>
    "tpu.trace_stop"() : () -> ()
    %262 = vector.shape_cast %261 : vector<8x8x32xf32> to vector<2x4x8x32xf32>
    %263 = vector.extract_strided_slice %262 {offsets = [0, 0, 0, 0], sizes = [2, 1, 8, 32], strides = [1, 1, 1, 1]} : vector<2x4x8x32xf32> to vector<2x1x8x32xf32>
    %264 = vector.shape_cast %263 : vector<2x1x8x32xf32> to vector<2x8x32xf32>
    %265 = vector.extract_strided_slice %262 {offsets = [0, 1, 0, 0], sizes = [2, 1, 8, 32], strides = [1, 1, 1, 1]} : vector<2x4x8x32xf32> to vector<2x1x8x32xf32>
    %266 = vector.shape_cast %265 : vector<2x1x8x32xf32> to vector<2x8x32xf32>
    %267 = arith.addf %264, %266 : vector<2x8x32xf32>
    %268 = vector.extract_strided_slice %262 {offsets = [0, 2, 0, 0], sizes = [2, 1, 8, 32], strides = [1, 1, 1, 1]} : vector<2x4x8x32xf32> to vector<2x1x8x32xf32>
    %269 = vector.shape_cast %268 : vector<2x1x8x32xf32> to vector<2x8x32xf32>
    %270 = arith.addf %267, %269 : vector<2x8x32xf32>
    %271 = vector.extract_strided_slice %262 {offsets = [0, 3, 0, 0], sizes = [2, 1, 8, 32], strides = [1, 1, 1, 1]} : vector<2x4x8x32xf32> to vector<2x1x8x32xf32>
    %272 = vector.shape_cast %271 : vector<2x1x8x32xf32> to vector<2x8x32xf32>
    %273 = arith.addf %270, %272 : vector<2x8x32xf32>
    %274 = vector.shape_cast %273 : vector<2x8x32xf32> to vector<16x32xf32>
    %c14_106 = arith.constant 14 : index
    %c0_107 = arith.constant 0 : index
    %c0_108 = arith.constant 0 : index
    %275 = vector.load %arg2[%c14_106, %c0_107, %c0_108] : memref<16x32x32xf32, #tpu.memory_space<vmem>>, vector<1x32x32xf32>
    %276 = vector.shape_cast %275 : vector<1x32x32xf32> to vector<32x32xf32>
    %cst_109 = arith.constant dense<0.000000e+00> : vector<16x32xf32>
    %277 = tpu.matmul %274, %276, %cst_109 {dimension_numbers = #tpu.dot_dimension_numbers<[1], [0], [0], [1], [0, 0, 1, 1], [], []>} : vector<16x32xf32>, vector<32x32xf32>, vector<16x32xf32> -> vector<16x32xf32>
    %278 = arith.addf %217, %277 : vector<16x32xf32>
    %c15 = arith.constant 15 : index
    %c0_110 = arith.constant 0 : index
    %279 = vector.load %arg3[%c15, %c0_110] : memref<18x32xf32, #tpu.memory_space<vmem>>, vector<1x32xf32>
    %280 = vector.broadcast %279 : vector<1x32xf32> to vector<16x32xf32>
    %281 = arith.addf %278, %280 : vector<16x32xf32>
    %c15_111 = arith.constant 15 : index
    %c0_112 = arith.constant 0 : index
    %c0_113 = arith.constant 0 : index
    %282 = vector.load %arg2[%c15_111, %c0_112, %c0_113] : memref<16x32x32xf32, #tpu.memory_space<vmem>>, vector<1x32x32xf32>
    %283 = vector.shape_cast %282 : vector<1x32x32xf32> to vector<32x32xf32>
    %cst_114 = arith.constant dense<0.000000e+00> : vector<16x32xf32>
    %284 = tpu.matmul %281, %283, %cst_114 {dimension_numbers = #tpu.dot_dimension_numbers<[1], [0], [0], [1], [0, 0, 1, 1], [], []>} : vector<16x32xf32>, vector<32x32xf32>, vector<16x32xf32> -> vector<16x32xf32>
    %285 = arith.addf %281, %284 : vector<16x32xf32>
    %c16 = arith.constant 16 : index
    %c0_115 = arith.constant 0 : index
    %286 = vector.load %arg3[%c16, %c0_115] : memref<18x32xf32, #tpu.memory_space<vmem>>, vector<1x32xf32>
    %287 = vector.broadcast %286 : vector<1x32xf32> to vector<16x32xf32>
    %288 = arith.addf %285, %287 : vector<16x32xf32>
    %cst_116 = arith.constant 5.000000e-01 : f32
    %289 = vector.broadcast %cst_116 : f32 to vector<16x32xf32>
    %290 = arith.mulf %289, %288 : vector<16x32xf32>
    %cst_117 = arith.constant 4.471500e-02 : f32
    %291 = vector.broadcast %cst_117 : f32 to vector<16x32xf32>
    %292 = arith.mulf %291, %288 : vector<16x32xf32>
    %293 = arith.mulf %292, %288 : vector<16x32xf32>
    %294 = arith.mulf %293, %288 : vector<16x32xf32>
    %295 = arith.addf %288, %294 : vector<16x32xf32>
    %cst_118 = arith.constant 0.797884583 : f32
    %296 = vector.broadcast %cst_118 : f32 to vector<16x32xf32>
    %297 = arith.mulf %296, %295 : vector<16x32xf32>
    %298 = math.tanh %297 : vector<16x32xf32>
    %cst_119 = arith.constant 1.000000e+00 : f32
    %299 = vector.broadcast %cst_119 : f32 to vector<16x32xf32>
    %300 = arith.addf %299, %298 : vector<16x32xf32>
    %301 = arith.mulf %290, %300 : vector<16x32xf32>
    %c0_120 = arith.constant 0 : index
    %c0_121 = arith.constant 0 : index
    %302 = vector.load %arg4[%c0_120, %c0_121] : memref<32x16xf32, #tpu.memory_space<vmem>>, vector<32x16xf32>
    %cst_122 = arith.constant dense<0.000000e+00> : vector<16x16xf32>
    %303 = tpu.matmul %301, %302, %cst_122 {dimension_numbers = #tpu.dot_dimension_numbers<[1], [0], [0], [1], [0, 0, 1, 1], [], []>} : vector<16x32xf32>, vector<32x16xf32>, vector<16x16xf32> -> vector<16x16xf32>
    %c17 = arith.constant 17 : index
    %c0_123 = arith.constant 0 : index
    %304 = vector.load %arg3[%c17, %c0_123] : memref<18x32xf32, #tpu.memory_space<vmem>>, vector<1x16xf32>
    %305 = vector.broadcast %304 : vector<1x16xf32> to vector<16x16xf32>
    %306 = arith.addf %303, %305 : vector<16x16xf32>
    %cst_124 = arith.constant 5.000000e-01 : f32
    %307 = vector.broadcast %cst_124 : f32 to vector<16x16xf32>
    %308 = arith.mulf %307, %306 : vector<16x16xf32>
    %cst_125 = arith.constant 4.471500e-02 : f32
    %309 = vector.broadcast %cst_125 : f32 to vector<16x16xf32>
    %310 = arith.mulf %309, %306 : vector<16x16xf32>
    %311 = arith.mulf %310, %306 : vector<16x16xf32>
    %312 = arith.mulf %311, %306 : vector<16x16xf32>
    %313 = arith.addf %306, %312 : vector<16x16xf32>
    %cst_126 = arith.constant 0.797884583 : f32
    %314 = vector.broadcast %cst_126 : f32 to vector<16x16xf32>
    %315 = arith.mulf %314, %313 : vector<16x16xf32>
    %316 = math.tanh %315 : vector<16x16xf32>
    %cst_127 = arith.constant 1.000000e+00 : f32
    %317 = vector.broadcast %cst_127 : f32 to vector<16x16xf32>
    %318 = arith.addf %317, %316 : vector<16x16xf32>
    %319 = arith.mulf %308, %318 : vector<16x16xf32>
    %320 = vector.shape_cast %319 : vector<16x16xf32> to vector<2x8x16xf32>
    %cst_128 = arith.constant dense<0.000000e+00> : vector<2x16xf32>
    %321 = vector.multi_reduction <add>, %320, %cst_128 [1] : vector<2x8x16xf32> to vector<2x16xf32>
    %cst_129 = arith.constant 8.000000e+00 : f32
    %322 = vector.broadcast %cst_129 : f32 to vector<2x16xf32>
    %323 = arith.divf %321, %322 : vector<2x16xf32>
    %c0_130 = arith.constant 0 : index
    %c0_131 = arith.constant 0 : index
    %324 = vector.load %arg5[%c0_130, %c0_131] : memref<2x16xf32, #tpu.memory_space<vmem>>, vector<2x16xf32>
    tpu.vector_store %arg5[%c0_130, %c0_131], %323 {strides = array<i32>} : memref<2x16xf32, #tpu.memory_space<vmem>>, vector<2x16xf32>,
    return
  }
}

</mosaic_0001>

<bundles_post_ra>
// kernel: polygon_transformer_forward.1
= control target key start
LH: loop header
LB: loop body
LE: loop exit
PB: predicated region body
PF: predicated region fallthrough
CT: control target
= control target key end

     0   :  { %10 = vsyncpa [#allocation3], 0  ;;  %s7406_s0 = inlined_call_operand.vmem [shape: f32[16,2], index: 0, kind: input, shape index: {}]   ;;  %s7407_s1 = inlined_call_operand.vmem [shape: f32[2,32], index: 1, kind: input, shape index: {}]   ;;  %s7408_s2 = inlined_call_operand.hbm [shape: f32[16,32,32], index: 2, kind: input, shape index: {}]   ;;  %s7409_s3 = inlined_call_operand.vmem [shape: f32[18,32], index: 3, kind: input, shape index: {}]   ;;  %s7410_s4 = inlined_call_operand.vmem [shape: f32[32,16], index: 4, kind: input, shape index: {}]   ;;  %s7411_s5 = inlined_call_operand.hbm [shape: f32[2,16], index: 5, kind: output, shape index: {}]  }
   0x1   :  { %11 = vsyncpa [#allocation4], 0  ;;  %s6802_s18 = smov [#allocation2]   ;;  %s6754_s22 = scalar_lea.hbm %s7408_s2, 8192 }
   0x2   :  { %s21_s19 = sshll.u32 %s6802_s18, 4  ;;  %p6755_p0 = scmp.ne.s32.totalorder %s7408_s2, %s6754_s22  ;;  %s22_s19 = int_to_ptr.vmem [resolvable:$true] %s21_s19 }
   0x3   :  { %p6758_p1 = scmp.lt.u32.totalorder %s6754_s22, %s7408_s2 }
   0x5   :  { %p6760_p2 = pnand %p6758_p1, %p6755_p0 }
   0x7   :  { %6763 = shalt.err (!%p6760_p2)
}
   0x8   :  { %s6764_s27 = scalar_lea.vmem %s22_s19, 8192  ;;  %p6769_p4 = scmp.lt.s32.totalorder %s22_s19, %s22_s19 }
   0x9   :  { %p6765_p3 = scmp.ne.s32.totalorder %s22_s19, %s6764_s27  ;;  %p6770_p5 = scmp.lt.s32.totalorder %s6764_s27, %s6764_s27 }
   0xb   :  { %p6771_p6 = por %p6770_p5, %p6769_p4 }
   0xd   :  { %p6772_p7 = pnand %p6771_p6, %p6765_p3 }
   0xf   :  { %6775 = shalt.err (!%p6772_p7)
}
  0x10   :  { %s6803_s28 = smov 128   ;;  %s6804_s29 = smov 8  }
  0x11   :  { %27 = dma.hbm_to_vmem [thread:$0]  %s7408_s2, 8192, %s22_s19, [#allocation3], %s6803_s28, %s6803_s28, %s6804_s29  }
  0x12   :  { %6798 = dma.done.wait [#allocation3], 8192  }
  0x13   :  { %6799 = vsyncadd [#allocation3], 4294959104  ;;  %v6805_v0 = vmov 0   ;;  %v36_v1 = vld [vmem:[%s7406_s0 + $0x8] sm:$0xff]  ;;  %v35_v2 = vld [vmem:[%s7406_s0] sm:$0xff]  ;;  %v6806_v3 = vmov 1  }
  0x14   :  { %6632 = vset.pattern.permute.xlu1 %v6805_v0  ;;  %6630 = vset.pattern.permute.xlu0 %v6805_v0  ;;  %v80_v4 = vld [vmem:[#allocation2] sm:$0xff]  ;;  %v81_v5 = vld [vmem:[#allocation2 + $0x8] sm:$0xff]  ;;  %v82_v6 = vld [vmem:[#allocation2 + $0x10] sm:$0xff]  ;;  %vm89_vm0 = vcmask 261120   ;;  %v6807_v42 = vmov 0.0   ;;  %vm6809_vm4 = vmmov 0  }
  0x15   :  { %45 = vperm.xlu1 %6632, %v36_v1   ;;  %40 = vperm.xlu0 %6630, %v35_v2   ;;  %v6449_v7 = vpack.c.bf16 %v81_v5, %v80_v4  ;;  %v83_v8 = vld [vmem:[#allocation2 + $0x18] sm:$0xff]  ;;  %v5698_v12 = vld [vmem:[%s7407_s1] ss:$0 sm:$0xff]  ;;  %v5699_v13 = vld [vmem:[%s7407_s1 + $0x1] ss:$0 sm:$0xff]  ;;  %v189_v5 = vlaneseq  ;;  %vm1157_vm5 = vcmask 64512  }
  0x16   :  { %v6453_v9 = vpack.c.bf16 %v83_v8, %v82_v6  ;;  %v5700_v20 = vld [vmem:[%s7409_s3] ss:$0 sm:$0xff]  ;;  %v252_v28 = vld [vmem:[#allocation2 + $0x28] sm:$0xff]  ;;  %v253_v32 = vld [vmem:[#allocation2 + $0x30] sm:$0xff]  ;;  %vm5658_vm6 = vcmask 130048   ;;  %vm5678_vm7 = vcmask 1041409  }
  0x17   :  { %6450 = vmatprep.subr.bf16.mxu0 %v6449_v7  ;;  %v251_v27 = vld [vmem:[#allocation2 + $0x20] sm:$0xff]  ;;  %v343_v31 = vld [vmem:[#allocation2 + $0x48] sm:$0xff]  ;;  %v254_v33 = vld [vmem:[#allocation2 + $0x38] sm:$0xff]  ;;  %v192_v6 = vshrl.u32 %v189_v5, 7  ;;  %v190_v8 = vand.u32 127, %v189_v5  ;;  %vm5681_vm8 = vcmask 123904  }
  0x18   :  { %6452 = vmatpush3.bf16.msra.mxu0 %v6449_v7  ;;  %v342_v29 = vld [vmem:[#allocation2 + $0x40] sm:$0xff]  ;;  %v6457_v30 = vpack.c.bf16 %v252_v28, %v251_v27  ;;  %v6461_v35 = vpack.c.bf16 %v254_v33, %v253_v32  ;;  %v344_v36 = vld [vmem:[#allocation2 + $0x50] sm:$0xff]  ;;  %v345_v37 = vld [vmem:[#allocation2 + $0x58] sm:$0xff] }
  0x19   :  { %6633 = vset.pattern.permute.xlu1 %v6806_v3  ;;  %6631 = vset.pattern.permute.xlu0 %v6806_v3  ;;  %v6465_v34 = vpack.c.bf16 %v343_v31, %v342_v29  ;;  %v6469_v38 = vpack.c.bf16 %v345_v37, %v344_v36  ;;  %v427_v39 = vld [vmem:[#allocation2 + $0x60] sm:$0xff]  ;;  %v428_v40 = vld [vmem:[#allocation2 + $0x68] sm:$0xff]  ;;  %v429_v63 = vld [vmem:[#allocation2 + $0x70] sm:$0xff]  ;;  %v193_v7 = vmul.u32 8, %v192_v6 }
  0x1a   :  { %60 = vperm.xlu1 %6633, %v36_v1   ;;  %56 = vperm.xlu0 %6631, %v35_v2   ;;  %v6473_v41 = vpack.c.bf16 %v428_v40, %v427_v39  ;;  %v5701_v43 = vld [vmem:[%s7409_s3 + $0x1] ss:$0 sm:$0xff]  ;;  %v430_v0 = vld [vmem:[#allocation2 + $0x78] sm:$0xff]  ;;  %v5707_v31 = vld [vmem:[%s7409_s3 + $0x3] ss:$0 sm:$0xff] }
  0x1b   :  { %6454 = vmatprep.subr.bf16.mxu0 %v6453_v9  ;;  %6458 = vmatprep.subr.bf16.mxu1 %v6457_v30  ;;  %v6477_v4 = vpack.c.bf16 %v430_v0, %v429_v63  ;;  %vm194_vm1 = vcmp.ge.s32.totalorder %v190_v8, %v193_v7 }
  0x1c   :  { %6456 = vmatpush3.bf16.msra.mxu0 %v6453_v9  ;;  %6460 = vmatpush3.bf16.msra.mxu1 %v6457_v30  ;;  %v195_v9 = vadd.s32 8, %v193_v7  ;;  %v5704_v30 = vld [vmem:[%s7409_s3 + $0x2] ss:$0 sm:$0xff] }
  0x1d   :  { %6466 = vmatprep.subr.bf16.mxu0 %v6465_v34  ;;  %6462 = vmatprep.subr.bf16.mxu1 %v6461_v35 }
  0x1e   :  { %vm196_vm2 = vcmp.lt.s32.totalorder %v190_v8, %v195_v9 }
  0x1f   :  { %vm197_vm3 = vmand %vm194_vm1, %vm196_vm2 }
  0x20   :  { %6464 = vmatpush3.bf16.msra.mxu1 %v6461_v35 }
  0x21   :  { %6474 = vmatprep.subr.bf16.mxu1 %v6473_v41 }
  0x94   :  { %v41_v10 = vpop.permute.xlu0 %40  ;;  %v46_v11 = vpop.permute.xlu1 %45 }
  0x95   :  { %v52_v16 = vmul.f32 %v5698_v12, %v41_v10  ;;  %v53_v17 = vmul.f32 %v5698_v12, %v46_v11  ;;  %v6808_v10 = vmov 1966171168  }
  0x96   :  { %v202_v11 = vunpack.c.l.s4 %v6808_v10 }
  0x98   :  { %v203_v12 = vunpack.c.0.s8 %v202_v11 }
  0x99   :  { %v61_v14 = vpop.permute.xlu1 %60  ;;  %v57_v15 = vpop.permute.xlu0 %56 }
  0x9a   :  { %v68_v18 = vmul.f32 %v5699_v13, %v61_v14  ;;  %v67_v19 = vmul.f32 %v5699_v13, %v57_v15  ;;  %v206_v13 = vsub.s32 %v203_v12, %v192_v6  ;;  %v198_v14 = vsel %vm197_vm3, 1.0, %v6807_v42 }
  0x9c   :  { %v70_v21 = vadd.f32 %v68_v18, %v53_v17  ;;  %v69_v22 = vadd.f32 %v67_v19, %v52_v16  ;;  %v232_v15 = vrot.slane %v198_v14, %v206_v13  ;;  %v513_v19 = vsub.s32 0, %v192_v6 }
  0x9e   :  { %v77_v23 = vadd.f32 %v5700_v20, %v70_v21  ;;  %v76_v24 = vadd.f32 %v5700_v20, %v69_v22  ;;  %v233_v16 = vcombine.high %v232_v15, %v232_v15  ;;  %v240_v17 = vrot.slane %v232_v15, %v206_v13 }
  0xa0   :  { %6634 = vtanh.f32 %v77_v23  ;;  %v247_v18 = vrot.slane %v233_v16, %v206_v13  ;;  %v248_v20 = vcombine.high %v240_v17, %v240_v17 }
  0xa1   :  { %6636 = vtanh.f32 %v76_v24 }
  0xa2   :  { %v249_v21 = vcombine.high %v247_v18, %v247_v18  ;;  %v6896_v22 = vrot.slane %v247_v18, %v513_v19  ;;  %v6898_v23 = vrot.slane %v248_v20, %v513_v19 }
  0xa4   :  { %v6900_v24 = vrot.slane %v249_v21, %v513_v19 }
  0xaa   :  { %v6635_v25 = vpop.eup %6634 }
  0xab   :  { %v6637_v26 = vpop.eup %6636 }
  0xac   :  { %6030 = vmatprep.mubr.msk.f32.mxu0 %vm89_vm0, %v6637_v26 }
  0xad   :  { %6031 = vmatmul.mubr.msk.f32.vlgmr.msra.gmra.mrb[0].mxu0 %vm89_vm0, %v6635_v25  ;;  %v199_v25 = vmul.f32 0.35355338, %v198_v14 }
  0xae   :  { %6468 = vmatpush3.bf16.msra.mxu0 %v6465_v34 }
  0xaf   :  { %6470 = vmatprep.subr.bf16.mxu0 %v6469_v38  ;;  %v207_v26 = vrot.slane %v199_v25, %v206_v13 }
  0xb1   :  { %v215_v27 = vrot.slane %v207_v26, %v206_v13  ;;  %v208_v29 = vcombine.high %v207_v26, %v207_v26 }
  0xb2   :  { %6472 = vmatpush3.bf16.msra.mxu0 %v6469_v38 }
  0xb3   :  { %6076 = vmatprep.subr.mxu0 %v6807_v42  ;;  %v223_v28 = vcombine.high %v215_v27, %v215_v27  ;;  %v6908_v33 = vrot.slane %v215_v27, %v513_v19  ;;  %v222_v36 = vrot.slane %v208_v29, %v206_v13 }
  0xb5   :  { %v6910_v34 = vrot.slane %v223_v28, %v513_v19 }
 0x180   :  { %v6032_v44 = vpop.f32.mrb[0].mxu0 }
 0x181   :  { %v168_v45 = vadd.f32 %v6032_v44, %v5701_v43  ;;  %v162_v46 = vpop.f32.mrb[1].mxu0  ;;  %v224_v44 = vcombine.high %v222_v36, %v222_v36 }
 0x182   :  { %v163_v47 = vadd.f32 %v5701_v43, %v162_v46 }
 0x183   :  { %v174_v48 = vmul.f32 0.044715, %v168_v45  ;;  %v172_v1 = vmul.f32 0.5, %v168_v45 }
 0x184   :  { %v173_v49 = vmul.f32 0.044715, %v163_v47  ;;  %v171_v61 = vmul.f32 0.5, %v163_v47 }
 0x185   :  { %v176_v50 = vmul.f32 %v174_v48, %v168_v45 }
 0x186   :  { %v175_v51 = vmul.f32 %v173_v49, %v163_v47  ;;  %v5710_v49 = vld [vmem:[%s7409_s3 + $0x4] ss:$0 sm:$0xff] }
 0x187   :  { %v178_v52 = vmul.f32 %v176_v50, %v168_v45  ;;  %v6926_v50 = vrot.slane %v224_v44, %v513_v19 }
 0x188   :  { %v177_v53 = vmul.f32 %v175_v51, %v163_v47 }
 0x189   :  { %v180_v54 = vadd.f32 %v178_v52, %v168_v45  ;;  %v6915_v45 = vrot.slane %v222_v36, %v513_v19 }
 0x18a   :  { %v179_v55 = vadd.f32 %v177_v53, %v163_v47 }
 0x18b   :  { %v182_v56 = vmul.f32 0.7978846, %v180_v54 }
 0x18c   :  { %v181_v57 = vmul.f32 0.7978846, %v179_v55  ;;  %v6940_v55 = vrot.slane %v240_v17, %v513_v19 }
 0x18d   :  { %6638 = vtanh.f32 %v182_v56 }
 0x18e   :  { %6640 = vtanh.f32 %v181_v57 }
 0x197   :  { %v6639_v58 = vpop.eup %6638 }
 0x198   :  { %v6641_v59 = vpop.eup %6640  ;;  %v186_v60 = vadd.f32 1.0, %v6639_v58 }
 0x199   :  { %v185_v62 = vadd.f32 1.0, %v6641_v59 }
 0x19a   :  { %v6876_v3 = vmul.f32 %v186_v60, %v172_v1 }
 0x19b   :  { %v6874_v2 = vmul.f32 %v185_v62, %v171_v61 }
 0x19d   :  { %6041 = vmatprep.mubr.msk.f32.mxu1 %vm89_vm0, %v6874_v2  ;;  %6052 = vmatprep.mubr.msk.f32.mxu0 %vm89_vm0, %v6874_v2 }
 0x19e   :  { %6042 = vmatmul.mubr.msk.f32.vlgmr.msra.gmra.mrb[0].mxu1 %vm89_vm0, %v6876_v3  ;;  %6053 = vmatmul.mubr.msk.f32.vlgmr.msra.gmra.mrb[2].mxu0 %vm89_vm0, %v6876_v3 }
 0x19f   :  { %6476 = vmatpush3.bf16.msra.mxu1 %v6473_v41  ;;  %6063 = vmatprep.mubr.msk.f32.mxu1 %vm89_vm0, %v6874_v2 }
 0x1a0   :  { %6478 = vmatprep.subr.bf16.mxu1 %v6477_v4  ;;  %6078 = vmatprep.mubr.msk.f32.mxu0 %vm6809_vm4, %v6807_v42 }
 0x1a3   :  { %6480 = vmatpush3.bf16.msra.mxu1 %v6477_v4 }
 0x1a4   :  { %6066 = vmatprep.subr.mxu1 %v6807_v42 }
 0x1a6   :  { %6064 = vmatmul.mubr.msk.f32.vlgmr.msra.gmra.mrb[2].mxu1 %vm89_vm0, %v6876_v3 }
 0x1a7   :  { %6068 = vmatprep.mubr.msk.f32.mxu1 %vm6809_vm4, %v6807_v42 }
 0x271   :  { %v6043_v32 = vpop.f32.mrb[0].mxu1  ;;  %v6054_v35 = vpop.f32.mrb[2].mxu0 }
 0x272   :  { %v332_v37 = vpop.f32.mrb[1].mxu1  ;;  %v417_v38 = vpop.f32.mrb[3].mxu0  ;;  %v338_v46 = vadd.f32 %v6043_v32, %v5704_v30  ;;  %v423_v47 = vadd.f32 %v6054_v35, %v5707_v31 }
 0x273   :  { %v333_v39 = vadd.f32 %v5704_v30, %v332_v37  ;;  %v418_v40 = vadd.f32 %v5707_v31, %v417_v38 }
 0x274   :  { %v535_v53 = vmul.f32 %v6908_v33, %v338_v46  ;;  %v537_v57 = vmul.f32 %v6910_v34, %v338_v46  ;;  %v536_v59 = vmul.f32 %v6915_v45, %v338_v46  ;;  %v538_v61 = vmul.f32 %v6926_v50, %v338_v46 }
 0x275   :  { %v531_v41 = vmul.f32 %v6908_v33, %v333_v39  ;;  %v533_v43 = vmul.f32 %v6910_v34, %v333_v39  ;;  %6067 = vmatpush3.xpose.msk.msra.mxu1 %vm89_vm0, %v418_v40  ;;  %6077 = vmatpush3.xpose.msk.msra.mxu0 %vm89_vm0, %v418_v40  ;;  %v532_v51 = vmul.f32 %v6915_v45, %v333_v39 }
 0x276   :  { %6071 = vmatprep.subr.mxu1 %v6807_v42  ;;  %6086 = vmatprep.subr.mxu0 %v6807_v42  ;;  %v534_v56 = vmul.f32 %v6926_v50, %v333_v39 }
 0x278   :  { %6069 = vmatmul.mubr.msk.f32.vlgmr.msra.gmra.mrb[4].mxu1 %vm89_vm0, %v531_v41  ;;  %6079 = vmatmul.mubr.msk.f32.vlgmr.msra.gmra.mrb[4].mxu0 %vm89_vm0, %v533_v43 }
 0x279   :  { %v6065_v48 = vpop.f32.mrb[2].mxu1  ;;  %6072 = vmatpush3.xpose.msk.msra.mxu1 %vm89_vm0, %v418_v40  ;;  %6087 = vmatpush3.xpose.msk.msra.mxu0 %vm89_vm0, %v423_v47 }
 0x27a   :  { %v502_v52 = vpop.f32.mrb[3].mxu1  ;;  %6073 = vmatprep.mubr.msk.f32.mxu1 %vm6809_vm4, %v6807_v42  ;;  %6088 = vmatprep.mubr.msk.f32.mxu0 %vm6809_vm4, %v6807_v42  ;;  %v6961_v60 = vadd.f32 %v6065_v48, %v5710_v49 }
 0x27b   :  { %6081 = vmatprep.subr.mxu1 %v6807_v42  ;;  %v6936_v54 = vadd.f32 %v5710_v49, %v502_v52  ;;  %6096 = vmatprep.subr.mxu0 %v6807_v42 }
 0x27c   :  { %6074 = vmatmul.mubr.msk.f32.vlgmr.msra.gmra.mrb[6].mxu1 %vm89_vm0, %v532_v51  ;;  %6089 = vmatmul.mubr.msk.f32.vlgmr.msra.gmra.mrb[6].mxu0 %vm89_vm0, %v535_v53  ;;  %v563_v62 = vmul.f32 %v6940_v55, %v6961_v60 }
 0x27d   :  { %6082 = vmatpush3.xpose.msk.msra.mxu1 %vm89_vm0, %v418_v40  ;;  %6097 = vmatpush3.xpose.msk.msra.mxu0 %vm89_vm0, %v423_v47  ;;  %v559_v58 = vmul.f32 %v6940_v55, %v6936_v54 }
 0x27e   :  { %6083 = vmatprep.mubr.msk.f32.mxu1 %vm6809_vm4, %v6807_v42  ;;  %6098 = vmatprep.mubr.msk.f32.mxu0 %vm6809_vm4, %v6807_v42 }
 0x27f   :  { %6091 = vmatprep.subr.mxu1 %v6807_v42  ;;  %6106 = vmatprep.subr.mxu0 %v6807_v42 }
 0x280   :  { %6084 = vmatmul.mubr.msk.f32.vlgmr.msra.gmra.mrb[8].mxu1 %vm89_vm0, %v534_v56  ;;  %6099 = vmatmul.mubr.msk.f32.vlgmr.msra.gmra.mrb[8].mxu0 %vm89_vm0, %v537_v57 }
 0x281   :  { %6092 = vmatpush3.xpose.msk.msra.mxu1 %vm89_vm0, %v423_v47  ;;  %6107 = vmatpush3.msra.mxu0 %v559_v58 }
 0x282   :  { %6093 = vmatprep.mubr.msk.f32.mxu1 %vm6809_vm4, %v6807_v42  ;;  %6101 = vmatprep.subr.mxu1 %v6807_v42 }
 0x283   :  { %6108 = vmatprep.mubr.msk.f32.mxu0 %vm6809_vm4, %v6807_v42  ;;  %6111 = vmatprep.subr.mxu0 %v6807_v42 }
 0x284   :  { %6094 = vmatmul.mubr.msk.f32.vlgmr.msra.gmra.mrb[10].mxu1 %vm89_vm0, %v536_v59 }
 0x285   :  { %6102 = vmatpush3.xpose.msk.msra.mxu1 %vm89_vm0, %v423_v47  ;;  %6103 = vmatprep.mubr.msk.f32.mxu1 %vm6809_vm4, %v6807_v42 }
 0x286   :  { %6126 = vmatprep.subr.mxu1 %v6807_v42 }
 0x288   :  { %6104 = vmatmul.mubr.msk.f32.vlgmr.msra.gmra.mrb[12].mxu1 %vm89_vm0, %v538_v61 }
 0x289   :  { %6127 = vmatpush3.msra.mxu1 %v563_v62  ;;  %6128 = vmatprep.mubr.msk.f32.mxu1 %vm6809_vm4, %v6807_v42 }
 0x28a   :  { %6131 = vmatprep.subr.mxu1 %v6807_v42 }
 0x34b   :  { %v639_v63 = vpop.f32.mrb[4].mxu1  ;;  %v785_v0 = vpop.f32.mrb[4].mxu0 }
 0x34c   :  { %v6070_v1 = vpop.f32.mrb[5].mxu1  ;;  %v1158_v4 = vsel %vm1157_vm5, %v639_v63, -inf  ;;  %v6080_v5 = vpop.f32.mrb[5].mxu0  ;;  %v1164_v19 = vsel %vm1157_vm5, %v785_v0, -inf }
 0x34d   :  { %1159 = vmax.xlane.f32.xlu1 %v1158_v4 }
 0x34f   :  { %v712_v6 = vpop.f32.mrb[6].mxu1  ;;  %v934_v7 = vpop.f32.mrb[6].mxu0 }
 0x350   :  { %v6075_v8 = vpop.f32.mrb[7].mxu1  ;;  %v6090_v9 = vpop.f32.mrb[7].mxu0  ;;  %v1170_v10 = vsel %vm1157_vm5, %v934_v7, -inf  ;;  %v1161_v15 = vsel %vm1157_vm5, %v712_v6, -inf }
 0x351   :  { %1171 = vmax.xlane.f32.xlu0 %v1170_v10 }
 0x353   :  { %v858_v11 = vpop.f32.mrb[8].mxu1  ;;  %v1080_v12 = vpop.f32.mrb[8].mxu0 }
 0x354   :  { %v6085_v13 = vpop.f32.mrb[9].mxu1  ;;  %v6100_v14 = vpop.f32.mrb[9].mxu0  ;;  %v1176_v25 = vsel %vm1157_vm5, %v1080_v12, -inf  ;;  %v1167_v26 = vsel %vm1157_vm5, %v858_v11, -inf }
 0x355   :  { %1162 = vmax.xlane.f32.xlu0 %v1161_v15 }
 0x357   :  { %v1007_v16 = vpop.f32.mrb[10].mxu1 }
 0x358   :  { %v6095_v17 = vpop.f32.mrb[11].mxu1  ;;  %v1173_v18 = vsel %vm1157_vm5, %v1007_v16, -inf }
 0x359   :  { %1174 = vmax.xlane.f32.xlu1 %v1173_v18  ;;  %1165 = vmax.xlane.f32.xlu0 %v1164_v19 }
 0x35b   :  { %v1153_v20 = vpop.f32.mrb[12].mxu1 }
 0x35c   :  { %v6105_v21 = vpop.f32.mrb[13].mxu1  ;;  %v1179_v27 = vsel %vm1157_vm5, %v1153_v20, -inf }
 0x35d   :  { %1177 = vmax.xlane.f32.xlu1 %v1176_v25  ;;  %1168 = vmax.xlane.f32.xlu0 %v1167_v26  ;;  %v560_v21 = vmul.f32 %v6896_v22, %v6936_v54 }
 0x361   :  { %1180 = vmax.xlane.f32.xlu1 %v1179_v27 }
 0x3da   :  { %v1160_v28 = vpop.xlane.xlu1 %1159 }
 0x3db   :  { %v1182_v29 = vsub.f32 %v639_v63, %v1160_v28  ;;  %v564_v28 = vmul.f32 %v6896_v22, %v6961_v60 }
 0x3dd   :  { %v1190_v30 = vmul.f32 1.442695, %v1182_v29 }
 0x3de   :  { %v1172_v31 = vpop.xlane.xlu0 %1171 }
 0x3df   :  { %6642 = vpow2.f32 %v1190_v30  ;;  %v1186_v32 = vsub.f32 %v934_v7, %v1172_v31 }
 0x3e1   :  { %v1198_v35 = vmul.f32 1.442695, %v1186_v32  ;;  %v561_v32 = vmul.f32 %v6898_v23, %v6936_v54 }
 0x3e2   :  { %v1163_v36 = vpop.xlane.xlu0 %1162 }
 0x3e3   :  { %6644 = vpow2.f32 %v1198_v35  ;;  %v1183_v37 = vsub.f32 %v712_v6, %v1163_v36 }
 0x3e5   :  { %v1192_v38 = vmul.f32 1.442695, %v1183_v37 }
 0x3e6   :  { %v1175_v39 = vpop.xlane.xlu1 %1174  ;;  %v1166_v40 = vpop.xlane.xlu0 %1165 }
 0x3e7   :  { %v1187_v41 = vsub.f32 %v1007_v16, %v1175_v39  ;;  %6646 = vpow2.f32 %v1192_v38  ;;  %v1184_v43 = vsub.f32 %v785_v0, %v1166_v40  ;;  %v565_v39 = vmul.f32 %v6898_v23, %v6961_v60  ;;  %v1837_v40 = vld [vmem:[#allocation2 + $0x80] sm:$0xff] }
 0x3e9   :  { %v6643_v44 = vpop.eup %6642  ;;  %v1200_v46 = vmul.f32 1.442695, %v1187_v41  ;;  %v1194_v47 = vmul.f32 1.442695, %v1184_v43  ;;  %v1838_v41 = vld [vmem:[#allocation2 + $0x88] sm:$0xff] }
 0x3ea   :  { %v1178_v48 = vpop.xlane.xlu1 %1177  ;;  %v1206_v49 = vsel %vm1157_vm5, %v6643_v44, 0.0  ;;  %v1169_v51 = vpop.xlane.xlu0 %1168 }
 0x3eb   :  { %6648 = vpow2.f32 %v1200_v46  ;;  %v1188_v52 = vsub.f32 %v1080_v12, %v1178_v48  ;;  %1207 = vadd.xlane.f32.xlu0 %v1206_v49  ;;  %v1185_v53 = vsub.f32 %v858_v11, %v1169_v51  ;;  %v566_v51 = vmul.f32 %v6900_v24, %v6961_v60  ;;  %v1932_v60 = vld [vmem:[#allocation2 + $0xa0] sm:$0xff] }
 0x3ec   :  { %6650 = vpow2.f32 %v1194_v47  ;;  %v562_v47 = vmul.f32 %v6900_v24, %v6936_v54 }
 0x3ed   :  { %v1202_v56 = vmul.f32 1.442695, %v1188_v52  ;;  %v6645_v57 = vpop.eup %6644  ;;  %v1196_v58 = vmul.f32 1.442695, %v1185_v53 }
 0x3ee   :  { %v1181_v59 = vpop.xlane.xlu1 %1180  ;;  %v1218_v62 = vsel %vm1157_vm5, %v6645_v57, 0.0 }
 0x3ef   :  { %6652 = vpow2.f32 %v1202_v56  ;;  %v1189_v61 = vsub.f32 %v1153_v20, %v1181_v59  ;;  %1219 = vadd.xlane.f32.xlu1 %v1218_v62  ;;  %v1839_v56 = vld [vmem:[#allocation2 + $0x90] sm:$0xff]  ;;  %v1933_v59 = vld [vmem:[#allocation2 + $0xa8] sm:$0xff] }
 0x3f0   :  { %6654 = vpow2.f32 %v1196_v58 }
 0x3f1   :  { %v1204_v63 = vmul.f32 1.442695, %v1189_v61  ;;  %v6647_v0 = vpop.eup %6646  ;;  %v6489_v61 = vpack.c.bf16 %v1933_v59, %v1932_v60  ;;  %v2224_v60 = vld [vmem:[#allocation2 + $0x118] sm:$0xff] }
 0x3f2   :  { %v1209_v1 = vsel %vm1157_vm5, %v6647_v0, 0.0 }
 0x3f3   :  { %6656 = vpow2.f32 %v1204_v63  ;;  %1210 = vadd.xlane.f32.xlu0 %v1209_v1 }
 0x3f5   :  { %v6649_v4 = vpop.eup %6648 }
 0x3f6   :  { %v6651_v5 = vpop.eup %6650  ;;  %v1221_v6 = vsel %vm1157_vm5, %v6649_v4, 0.0 }
 0x3f7   :  { %v1212_v7 = vsel %vm1157_vm5, %v6651_v5, 0.0  ;;  %1222 = vadd.xlane.f32.xlu1 %v1221_v6 }
 0x3f8   :  { %1213 = vadd.xlane.f32.xlu0 %v1212_v7 }
 0x3f9   :  { %v6992_v8 = vpop.eup %6652 }
 0x3fa   :  { %v6994_v9 = vpop.eup %6654  ;;  %v1224_v10 = vsel %vm1157_vm5, %v6992_v8, 0.0 }
 0x3fb   :  { %v1215_v11 = vsel %vm1157_vm5, %v6994_v9, 0.0  ;;  %1225 = vadd.xlane.f32.xlu1 %v1224_v10 }
 0x3fc   :  { %1216 = vadd.xlane.f32.xlu0 %v1215_v11 }
 0x3fd   :  { %v7000_v12 = vpop.eup %6656 }
 0x3fe   :  { %v1227_v13 = vsel %vm1157_vm5, %v7000_v12, 0.0 }
 0x3ff   :  { %1228 = vadd.xlane.f32.xlu1 %v1227_v13 }
 0x478   :  { %v1208_v14 = vpop.xlane.xlu0 %1207 }
 0x479   :  { %6658 = vrcp.f32 %v1208_v14  ;;  %v2045_v14 = vld [vmem:[#allocation2 + $0xc0] sm:$0xff] }
 0x47c   :  { %v1220_v15 = vpop.xlane.xlu1 %1219 }
 0x47d   :  { %6660 = vrcp.f32 %v1220_v15  ;;  %v2046_v15 = vld [vmem:[#allocation2 + $0xc8] sm:$0xff] }
 0x480   :  { %v1211_v16 = vpop.xlane.xlu0 %1210 }
 0x481   :  { %6662 = vrcp.f32 %v1211_v16  ;;  %v2136_v16 = vld [vmem:[#allocation2 + $0xe0] sm:$0xff] }
 0x483   :  { %v6659_v17 = vpop.eup %6658 }
 0x484   :  { %v1238_v18 = vmul.f32 %v6659_v17, %v6643_v44  ;;  %v1223_v19 = vpop.xlane.xlu1 %1222  ;;  %v6481_v44 = vpack.c.bf16 %v1838_v41, %v1837_v40  ;;  %v6497_v17 = vpack.c.bf16 %v2046_v15, %v2045_v14  ;;  %v5749_v15 = vld [vmem:[%s7409_s3 + $0x9] ss:$0 sm:$0xff] }
 0x485   :  { %v1214_v20 = vpop.xlane.xlu0 %1213  ;;  %6664 = vrcp.f32 %v1223_v19  ;;  %v2047_v19 = vld [vmem:[#allocation2 + $0xd0] sm:$0xff] }
 0x486   :  { %6109 = vmatmul.mubr.msk.f32.vlgmr.msra.gmra.mrb[10].mxu0 %vm1157_vm5, %v1238_v18  ;;  %6666 = vrcp.f32 %v1214_v20  ;;  %v2137_v18 = vld [vmem:[#allocation2 + $0xe8] sm:$0xff] }
 0x487   :  { %6112 = vmatpush3.msra.mxu0 %v560_v21  ;;  %6113 = vmatprep.mubr.msk.f32.mxu0 %vm6809_vm4, %v6807_v42  ;;  %v6661_v25 = vpop.eup %6660  ;;  %v6505_v20 = vpack.c.bf16 %v2137_v18, %v2136_v16 }
 0x488   :  { %6116 = vmatprep.subr.mxu0 %v6807_v42  ;;  %v1242_v26 = vmul.f32 %v6661_v25, %v6645_v57  ;;  %v1226_v27 = vpop.xlane.xlu1 %1225  ;;  %v1840_v57 = vld [vmem:[#allocation2 + $0x98] sm:$0xff]  ;;  %v2138_v25 = vld [vmem:[#allocation2 + $0xf0] sm:$0xff] }
 0x489   :  { %6668 = vrcp.f32 %v1226_v27  ;;  %v1217_v31 = vpop.xlane.xlu0 %1216  ;;  %v6485_v58 = vpack.c.bf16 %v1840_v57, %v1839_v56 }
 0x48a   :  { %6129 = vmatmul.mubr.msk.f32.vlgmr.msra.gmra.mrb[14].mxu1 %vm1157_vm5, %v1242_v26  ;;  %6670 = vrcp.f32 %v1217_v31  ;;  %v2139_v26 = vld [vmem:[#allocation2 + $0xf8] sm:$0xff]  ;;  %v5742_v31 = vld [vmem:[%s7409_s3 + $0x6] ss:$0 sm:$0xff] }
 0x48b   :  { %v6663_v29 = vpop.eup %6662  ;;  %6132 = vmatpush3.msra.mxu1 %v564_v28  ;;  %6133 = vmatprep.mubr.msk.f32.mxu1 %vm6809_vm4, %v6807_v42  ;;  %v6509_v27 = vpack.c.bf16 %v2139_v26, %v2138_v25  ;;  %v2222_v28 = vld [vmem:[#allocation2 + $0x108] sm:$0xff] }
 0x48c   :  { %v1239_v30 = vmul.f32 %v6663_v29, %v6647_v0  ;;  %6136 = vmatprep.subr.mxu1 %v6807_v42  ;;  %v1229_v37 = vpop.xlane.xlu1 %1228 }
 0x48d   :  { %6672 = vrcp.f32 %v1229_v37 }
 0x48e   :  { %6114 = vmatmul.mubr.msk.f32.vlgmr.msra.gmra.mrb[10].mxu0 %vm1157_vm5, %v1239_v30 }
 0x48f   :  { %v6665_v35 = vpop.eup %6664  ;;  %6117 = vmatpush3.msra.mxu0 %v561_v32  ;;  %6118 = vmatprep.mubr.msk.f32.mxu0 %vm6809_vm4, %v6807_v42 }
 0x490   :  { %v1243_v36 = vmul.f32 %v6665_v35, %v6649_v4  ;;  %6121 = vmatprep.subr.mxu0 %v6807_v42  ;;  %v6667_v38 = vpop.eup %6666  ;;  %v1934_v4 = vld [vmem:[#allocation2 + $0xb0] sm:$0xff] }
 0x491   :  { %v1240_v43 = vmul.f32 %v6667_v38, %v6651_v5  ;;  %v1935_v5 = vld [vmem:[#allocation2 + $0xb8] sm:$0xff] }
 0x492   :  { %6134 = vmatmul.mubr.msk.f32.vlgmr.msra.gmra.mrb[14].mxu1 %vm1157_vm5, %v1243_v36  ;;  %v6493_v6 = vpack.c.bf16 %v1935_v5, %v1934_v4 }
 0x493   :  { %6137 = vmatpush3.msra.mxu1 %v565_v39  ;;  %6138 = vmatprep.mubr.msk.f32.mxu1 %vm6809_vm4, %v6807_v42  ;;  %v6669_v46 = vpop.eup %6668 }
 0x494   :  { %6141 = vmatprep.subr.mxu1 %v6807_v42  ;;  %v1244_v48 = vmul.f32 %v6669_v46, %v6992_v8  ;;  %v6671_v49 = vpop.eup %6670 }
 0x495   :  { %v1241_v54 = vmul.f32 %v6671_v49, %v6994_v9  ;;  %v5739_v9 = vld [vmem:[%s7409_s3 + $0x5] ss:$0 sm:$0xff] }
 0x496   :  { %6119 = vmatmul.mubr.msk.f32.vlgmr.msra.gmra.mrb[10].mxu0 %vm1157_vm5, %v1240_v43 }
 0x497   :  { %6122 = vmatpush3.msra.mxu0 %v562_v47  ;;  %6123 = vmatprep.mubr.msk.f32.mxu0 %vm6809_vm4, %v6807_v42  ;;  %v6673_v52 = vpop.eup %6672 }
 0x498   :  { %6482 = vmatprep.subr.bf16.mxu0 %v6481_v44  ;;  %v1245_v53 = vmul.f32 %v6673_v52, %v7000_v12 }
 0x49a   :  { %6139 = vmatmul.mubr.msk.f32.vlgmr.msra.gmra.mrb[14].mxu1 %vm1157_vm5, %v1244_v48 }
 0x49b   :  { %6142 = vmatpush3.msra.mxu1 %v566_v51  ;;  %6143 = vmatprep.mubr.msk.f32.mxu1 %vm6809_vm4, %v6807_v42 }
 0x49c   :  { %6490 = vmatprep.subr.bf16.mxu1 %v6489_v61 }
 0x49e   :  { %6124 = vmatmul.mubr.msk.f32.vlgmr.msra.gmra.mrb[10].mxu0 %vm1157_vm5, %v1241_v54 }
 0x49f   :  { %6484 = vmatpush3.bf16.msra.mxu0 %v6481_v44 }
 0x4a0   :  { %6486 = vmatprep.subr.bf16.mxu0 %v6485_v58 }
 0x4a2   :  { %6144 = vmatmul.mubr.msk.f32.vlgmr.msra.gmra.mrb[14].mxu1 %vm1157_vm5, %v1245_v53 }
 0x4a3   :  { %6488 = vmatpush3.bf16.msra.mxu0 %v6485_v58  ;;  %6492 = vmatpush3.bf16.msra.mxu1 %v6489_v61  ;;  %v2223_v58 = vld [vmem:[#allocation2 + $0x110] sm:$0xff] }
 0x4a4   :  { %6494 = vmatprep.subr.bf16.mxu1 %v6493_v6  ;;  %6498 = vmatprep.subr.bf16.mxu0 %v6497_v17 }
 0x4a7   :  { %6496 = vmatpush3.bf16.msra.mxu1 %v6493_v6 }
 0x4a8   :  { %6506 = vmatprep.subr.bf16.mxu1 %v6505_v20 }
 0x571   :  { %v1534_v62 = vpop.f32.mrb[10].mxu0 }
 0x572   :  { %v6125_v63 = vpop.f32.mrb[11].mxu0  ;;  %6154 = vmatprep.mubr.msk.f32.mxu0 %vm89_vm0, %v1534_v62 }
 0x573   :  { %v6517_v63 = vpack.c.bf16 %v2224_v60, %v2223_v58 }
 0x575   :  { %v1826_v0 = vpop.f32.mrb[14].mxu1 }
 0x576   :  { %v6145_v1 = vpop.f32.mrb[15].mxu1  ;;  %6155 = vmatmul.mubr.msk.f32.vlgmr.msra.gmra.mrb[12].mxu0 %vm89_vm0, %v1826_v0  ;;  %v5743_v0 = vld [vmem:[%s7409_s3 + $0x7] ss:$0 sm:$0xff] }
 0x577   :  { %6500 = vmatpush3.bf16.msra.mxu0 %v6497_v17  ;;  %v5746_v1 = vld [vmem:[%s7409_s3 + $0x8] ss:$0 sm:$0xff] }
 0x649   :  { %v6156_v7 = vpop.f32.mrb[12].mxu0 }
 0x64a   :  { %v1923_v8 = vadd.f32 %v6156_v7, %v6876_v3  ;;  %v1913_v10 = vpop.f32.mrb[13].mxu0  ;;  %v2048_v3 = vld [vmem:[#allocation2 + $0xd8] sm:$0xff] }
 0x64b   :  { %v1922_v11 = vadd.f32 %v1913_v10, %v6874_v2  ;;  %v6501_v21 = vpack.c.bf16 %v2048_v3, %v2047_v19  ;;  %v2221_v2 = vld [vmem:[#allocation2 + $0x100] sm:$0xff] }
 0x64c   :  { %v1930_v13 = vadd.f32 %v5739_v9, %v1923_v8  ;;  %v6513_v29 = vpack.c.bf16 %v2222_v28, %v2221_v2 }
 0x64d   :  { %v1929_v12 = vadd.f32 %v5739_v9, %v1922_v11  ;;  %6502 = vmatprep.subr.bf16.mxu0 %v6501_v21 }
 0x64e   :  { %6504 = vmatpush3.bf16.msra.mxu0 %v6501_v21 }
 0x64f   :  { %6165 = vmatprep.mubr.msk.f32.mxu1 %vm89_vm0, %v1929_v12  ;;  %6514 = vmatprep.subr.bf16.mxu0 %v6513_v29 }
 0x650   :  { %6166 = vmatmul.mubr.msk.f32.vlgmr.msra.gmra.mrb[16].mxu1 %vm89_vm0, %v1930_v13 }
 0x651   :  { %6508 = vmatpush3.bf16.msra.mxu1 %v6505_v20 }
 0x652   :  { %6510 = vmatprep.subr.bf16.mxu1 %v6509_v27 }
 0x655   :  { %6512 = vmatpush3.bf16.msra.mxu1 %v6509_v27 }
 0x656   :  { %6201 = vmatprep.subr.mxu1 %v6807_v42 }
 0x723   :  { %v6167_v30 = vpop.f32.mrb[16].mxu1 }
 0x724   :  { %v2018_v32 = vadd.f32 %v6167_v30, %v1930_v13  ;;  %v2008_v35 = vpop.f32.mrb[17].mxu1 }
 0x725   :  { %v2017_v36 = vadd.f32 %v2008_v35, %v1929_v12 }
 0x726   :  { %v2025_v37 = vadd.f32 %v5742_v31, %v2018_v32 }
 0x727   :  { %v2024_v38 = vadd.f32 %v5742_v31, %v2017_v36 }
 0x728   :  { %v2029_v39 = vmul.f32 0.044715, %v2025_v37  ;;  %v2027_v59 = vmul.f32 0.5, %v2025_v37 }
 0x729   :  { %v2028_v40 = vmul.f32 0.044715, %v2024_v38  ;;  %v2026_v56 = vmul.f32 0.5, %v2024_v38 }
 0x72a   :  { %v2031_v41 = vmul.f32 %v2029_v39, %v2025_v37 }
 0x72b   :  { %v2030_v43 = vmul.f32 %v2028_v40, %v2024_v38 }
 0x72c   :  { %v2033_v44 = vmul.f32 %v2031_v41, %v2025_v37 }
 0x72d   :  { %v2032_v46 = vmul.f32 %v2030_v43, %v2024_v38 }
 0x72e   :  { %v2035_v47 = vadd.f32 %v2033_v44, %v2025_v37 }
 0x72f   :  { %v2034_v48 = vadd.f32 %v2032_v46, %v2024_v38 }
 0x730   :  { %v2037_v49 = vmul.f32 0.7978846, %v2035_v47 }
 0x731   :  { %v2036_v51 = vmul.f32 0.7978846, %v2034_v48 }
 0x732   :  { %6674 = vtanh.f32 %v2037_v49 }
 0x733   :  { %6676 = vtanh.f32 %v2036_v51 }
 0x73c   :  { %v6675_v54 = vpop.eup %6674 }
 0x73d   :  { %v6677_v52 = vpop.eup %6676  ;;  %v2041_v53 = vadd.f32 1.0, %v6675_v54 }
 0x73e   :  { %v2040_v57 = vadd.f32 1.0, %v6677_v52 }
 0x73f   :  { %v7058_v62 = vmul.f32 %v2041_v53, %v2027_v59 }
 0x740   :  { %v7056_v61 = vmul.f32 %v2040_v57, %v2026_v56 }
 0x742   :  { %6176 = vmatprep.mubr.msk.f32.mxu0 %vm89_vm0, %v7056_v61  ;;  %6187 = vmatprep.mubr.msk.f32.mxu1 %vm89_vm0, %v7056_v61 }
 0x743   :  { %6177 = vmatmul.mubr.msk.f32.vlgmr.msra.gmra.mrb[14].mxu0 %vm89_vm0, %v7058_v62  ;;  %6188 = vmatmul.mubr.msk.f32.vlgmr.msra.gmra.mrb[18].mxu1 %vm89_vm0, %v7058_v62 }
 0x744   :  { %6516 = vmatpush3.bf16.msra.mxu0 %v6513_v29  ;;  %6198 = vmatprep.mubr.msk.f32.mxu0 %vm89_vm0, %v7056_v61 }
 0x745   :  { %6518 = vmatprep.subr.bf16.mxu0 %v6517_v63  ;;  %6203 = vmatprep.mubr.msk.f32.mxu1 %vm6809_vm4, %v6807_v42 }
 0x748   :  { %6520 = vmatpush3.bf16.msra.mxu0 %v6517_v63 }
 0x749   :  { %6211 = vmatprep.subr.mxu0 %v6807_v42 }
 0x74b   :  { %6199 = vmatmul.mubr.msk.f32.vlgmr.msra.gmra.mrb[16].mxu0 %vm89_vm0, %v7058_v62 }
 0x74c   :  { %6213 = vmatprep.mubr.msk.f32.mxu0 %vm6809_vm4, %v6807_v42 }
 0x816   :  { %v6178_v4 = vpop.f32.mrb[14].mxu0  ;;  %v6189_v5 = vpop.f32.mrb[18].mxu1 }
 0x817   :  { %v2126_v6 = vpop.f32.mrb[15].mxu0  ;;  %v2211_v7 = vpop.f32.mrb[19].mxu1  ;;  %v2132_v12 = vadd.f32 %v6178_v4, %v5743_v0  ;;  %v2217_v13 = vadd.f32 %v6189_v5, %v5746_v1 }
 0x818   :  { %v2127_v8 = vadd.f32 %v5743_v0, %v2126_v6  ;;  %v2212_v9 = vadd.f32 %v5746_v1, %v2211_v7 }
 0x819   :  { %v2309_v18 = vmul.f32 %v2132_v12, %v6908_v33  ;;  %v2311_v20 = vmul.f32 %v2132_v12, %v6910_v34  ;;  %v2310_v25 = vmul.f32 %v2132_v12, %v6915_v45  ;;  %v2312_v27 = vmul.f32 %v2132_v12, %v6926_v50 }
 0x81a   :  { %v2305_v10 = vmul.f32 %v2127_v8, %v6908_v33  ;;  %v2307_v11 = vmul.f32 %v2127_v8, %v6910_v34  ;;  %6202 = vmatpush3.xpose.msk.msra.mxu1 %vm89_vm0, %v2212_v9  ;;  %6212 = vmatpush3.xpose.msk.msra.mxu0 %vm89_vm0, %v2212_v9  ;;  %v2306_v16 = vmul.f32 %v2127_v8, %v6915_v45 }
 0x81b   :  { %6206 = vmatprep.subr.mxu1 %v6807_v42  ;;  %6221 = vmatprep.subr.mxu0 %v6807_v42  ;;  %v2308_v3 = vmul.f32 %v2127_v8, %v6926_v50 }
 0x81d   :  { %6204 = vmatmul.mubr.msk.f32.vlgmr.msra.gmra.mrb[20].mxu1 %vm89_vm0, %v2305_v10  ;;  %6214 = vmatmul.mubr.msk.f32.vlgmr.msra.gmra.mrb[18].mxu0 %vm89_vm0, %v2307_v11 }
 0x81e   :  { %v6200_v14 = vpop.f32.mrb[16].mxu0  ;;  %6207 = vmatpush3.xpose.msk.msra.mxu1 %vm89_vm0, %v2212_v9  ;;  %6222 = vmatpush3.xpose.msk.msra.mxu0 %vm89_vm0, %v2217_v13 }
 0x81f   :  { %v2296_v17 = vpop.f32.mrb[17].mxu0  ;;  %6208 = vmatprep.mubr.msk.f32.mxu1 %vm6809_vm4, %v6807_v42  ;;  %6223 = vmatprep.mubr.msk.f32.mxu0 %vm6809_vm4, %v6807_v42  ;;  %v7126_v26 = vadd.f32 %v6200_v14, %v5749_v15 }
 0x820   :  { %6216 = vmatprep.subr.mxu1 %v6807_v42  ;;  %v7103_v19 = vadd.f32 %v5749_v15, %v2296_v17  ;;  %6231 = vmatprep.subr.mxu0 %v6807_v42 }
 0x821   :  { %6209 = vmatmul.mubr.msk.f32.vlgmr.msra.gmra.mrb[22].mxu1 %vm89_vm0, %v2306_v16  ;;  %6224 = vmatmul.mubr.msk.f32.vlgmr.msra.gmra.mrb[20].mxu0 %vm89_vm0, %v2309_v18  ;;  %v2317_v2 = vmul.f32 %v7126_v26, %v6940_v55 }
 0x822   :  { %6217 = vmatpush3.xpose.msk.msra.mxu1 %vm89_vm0, %v2212_v9  ;;  %6232 = vmatpush3.xpose.msk.msra.mxu0 %vm89_vm0, %v2217_v13  ;;  %v2313_v21 = vmul.f32 %v7103_v19, %v6940_v55 }
 0x823   :  { %6218 = vmatprep.mubr.msk.f32.mxu1 %vm6809_vm4, %v6807_v42  ;;  %6233 = vmatprep.mubr.msk.f32.mxu0 %vm6809_vm4, %v6807_v42 }
 0x824   :  { %6226 = vmatprep.subr.mxu1 %v6807_v42  ;;  %6241 = vmatprep.subr.mxu0 %v6807_v42 }
 0x825   :  { %6219 = vmatmul.mubr.msk.f32.vlgmr.msra.gmra.mrb[24].mxu1 %vm89_vm0, %v2308_v3  ;;  %6234 = vmatmul.mubr.msk.f32.vlgmr.msra.gmra.mrb[22].mxu0 %vm89_vm0, %v2311_v20 }
 0x826   :  { %6227 = vmatpush3.xpose.msk.msra.mxu1 %vm89_vm0, %v2217_v13  ;;  %6242 = vmatpush3.msra.mxu0 %v2313_v21 }
 0x827   :  { %6228 = vmatprep.mubr.msk.f32.mxu1 %vm6809_vm4, %v6807_v42  ;;  %6236 = vmatprep.subr.mxu1 %v6807_v42 }
 0x828   :  { %6243 = vmatprep.mubr.msk.f32.mxu0 %vm6809_vm4, %v6807_v42  ;;  %6246 = vmatprep.subr.mxu0 %v6807_v42 }
 0x829   :  { %6229 = vmatmul.mubr.msk.f32.vlgmr.msra.gmra.mrb[26].mxu1 %vm89_vm0, %v2310_v25 }
 0x82a   :  { %6237 = vmatpush3.xpose.msk.msra.mxu1 %vm89_vm0, %v2217_v13  ;;  %6238 = vmatprep.mubr.msk.f32.mxu1 %vm6809_vm4, %v6807_v42 }
 0x82b   :  { %6261 = vmatprep.subr.mxu1 %v6807_v42 }
 0x82d   :  { %6239 = vmatmul.mubr.msk.f32.vlgmr.msra.gmra.mrb[28].mxu1 %vm89_vm0, %v2312_v27 }
 0x82e   :  { %6262 = vmatpush3.msra.mxu1 %v2317_v2  ;;  %6263 = vmatprep.mubr.msk.f32.mxu1 %vm6809_vm4, %v6807_v42 }
 0x82f   :  { %6266 = vmatprep.subr.mxu1 %v6807_v42 }
 0x8f0   :  { %v2393_v28 = vpop.f32.mrb[20].mxu1  ;;  %v2539_v29 = vpop.f32.mrb[18].mxu0 }
 0x8f1   :  { %v6205_v30 = vpop.f32.mrb[21].mxu1  ;;  %v2911_v31 = vsel %vm1157_vm5, %v2393_v28, -inf  ;;  %v6215_v32 = vpop.f32.mrb[19].mxu0  ;;  %v2917_v46 = vsel %vm1157_vm5, %v2539_v29, -inf }
 0x8f2   :  { %2912 = vmax.xlane.f32.xlu0 %v2911_v31 }
 0x8f4   :  { %v2466_v35 = vpop.f32.mrb[22].mxu1  ;;  %v2688_v36 = vpop.f32.mrb[20].mxu0 }
 0x8f5   :  { %v6210_v37 = vpop.f32.mrb[23].mxu1  ;;  %v2914_v38 = vsel %vm1157_vm5, %v2466_v35, -inf  ;;  %v6225_v39 = vpop.f32.mrb[21].mxu0  ;;  %v2923_v40 = vsel %vm1157_vm5, %v2688_v36, -inf }
 0x8f6   :  { %2915 = vmax.xlane.f32.xlu0 %v2914_v38  ;;  %2924 = vmax.xlane.f32.xlu1 %v2923_v40 }
 0x8f8   :  { %v2612_v41 = vpop.f32.mrb[24].mxu1  ;;  %v2834_v43 = vpop.f32.mrb[22].mxu0 }
 0x8f9   :  { %v6220_v44 = vpop.f32.mrb[25].mxu1  ;;  %v6235_v47 = vpop.f32.mrb[23].mxu0  ;;  %v2920_v51 = vsel %vm1157_vm5, %v2612_v41, -inf  ;;  %v2929_v56 = vsel %vm1157_vm5, %v2834_v43, -inf }
 0x8fa   :  { %2918 = vmax.xlane.f32.xlu0 %v2917_v46 }
 0x8fc   :  { %v2761_v48 = vpop.f32.mrb[26].mxu1 }
 0x8fd   :  { %v6230_v49 = vpop.f32.mrb[27].mxu1  ;;  %v2926_v54 = vsel %vm1157_vm5, %v2761_v48, -inf }
 0x8fe   :  { %2921 = vmax.xlane.f32.xlu0 %v2920_v51  ;;  %2927 = vmax.xlane.f32.xlu1 %v2926_v54 }
 0x900   :  { %v2907_v52 = vpop.f32.mrb[28].mxu1 }
 0x901   :  { %v6240_v53 = vpop.f32.mrb[29].mxu1  ;;  %v2932_v57 = vsel %vm1157_vm5, %v2907_v52, -inf }
 0x902   :  { %2930 = vmax.xlane.f32.xlu1 %v2929_v56 }
 0x906   :  { %2933 = vmax.xlane.f32.xlu1 %v2932_v57 }
 0x97f   :  { %v2913_v58 = vpop.xlane.xlu0 %2912 }
 0x980   :  { %v2935_v60 = vsub.f32 %v2393_v28, %v2913_v58 }
 0x982   :  { %v2943_v59 = vmul.f32 1.442695, %v2935_v60  ;;  %v2318_v60 = vmul.f32 %v7126_v26, %v6896_v22 }
 0x983   :  { %v2916_v63 = vpop.xlane.xlu0 %2915  ;;  %v2925_v0 = vpop.xlane.xlu1 %2924 }
 0x984   :  { %6678 = vpow2.f32 %v2943_v59  ;;  %v2936_v1 = vsub.f32 %v2466_v35, %v2916_v63  ;;  %v2939_v4 = vsub.f32 %v2688_v36, %v2925_v0  ;;  %v2315_v0 = vmul.f32 %v7103_v19, %v6898_v23 }
 0x986   :  { %v2945_v5 = vmul.f32 1.442695, %v2936_v1  ;;  %v2951_v6 = vmul.f32 1.442695, %v2939_v4 }
 0x987   :  { %v2919_v7 = vpop.xlane.xlu0 %2918 }
 0x988   :  { %6680 = vpow2.f32 %v2945_v5  ;;  %v2937_v8 = vsub.f32 %v2539_v29, %v2919_v7  ;;  %v3590_v7 = vld [vmem:[#allocation2 + $0x120] sm:$0xff] }
 0x989   :  { %6682 = vpow2.f32 %v2951_v6 }
 0x98a   :  { %v2947_v9 = vmul.f32 1.442695, %v2937_v8  ;;  %v3591_v8 = vld [vmem:[#allocation2 + $0x128] sm:$0xff] }
 0x98b   :  { %v2922_v10 = vpop.xlane.xlu0 %2921  ;;  %v2928_v11 = vpop.xlane.xlu1 %2927 }
 0x98c   :  { %6684 = vpow2.f32 %v2947_v9  ;;  %v2938_v12 = vsub.f32 %v2612_v41, %v2922_v10  ;;  %v2940_v13 = vsub.f32 %v2761_v48, %v2928_v11  ;;  %v2319_v9 = vmul.f32 %v7126_v26, %v6898_v23 }
 0x98d   :  { %v6521_v11 = vpack.c.bf16 %v3591_v8, %v3590_v7 }
 0x98e   :  { %v6679_v14 = vpop.eup %6678  ;;  %v2949_v15 = vmul.f32 1.442695, %v2938_v12  ;;  %v2953_v16 = vmul.f32 1.442695, %v2940_v13  ;;  %v2316_v12 = vmul.f32 %v7103_v19, %v6900_v24 }
 0x98f   :  { %v2931_v17 = vpop.xlane.xlu1 %2930  ;;  %v2959_v18 = vsel %vm1157_vm5, %v6679_v14, 0.0 }
 0x990   :  { %6686 = vpow2.f32 %v2949_v15  ;;  %v2941_v3 = vsub.f32 %v2834_v43, %v2931_v17  ;;  %2960 = vadd.xlane.f32.xlu0 %v2959_v18 }
 0x991   :  { %6688 = vpow2.f32 %v2953_v16  ;;  %v2320_v16 = vmul.f32 %v7126_v26, %v6900_v24  ;;  %v3685_v26 = vld [vmem:[#allocation2 + $0x140] sm:$0xff] }
 0x992   :  { %v6681_v20 = vpop.eup %6680  ;;  %v2955_v21 = vmul.f32 1.442695, %v2941_v3  ;;  %v3592_v3 = vld [vmem:[#allocation2 + $0x130] sm:$0xff] }
 0x993   :  { %v6683_v25 = vpop.eup %6682  ;;  %v2934_v27 = vpop.xlane.xlu1 %2933  ;;  %v2962_v2 = vsel %vm1157_vm5, %v6681_v20, 0.0 }
 0x994   :  { %6690 = vpow2.f32 %v2955_v21  ;;  %v2942_v28 = vsub.f32 %v2907_v52, %v2934_v27  ;;  %2963 = vadd.xlane.f32.xlu0 %v2962_v2  ;;  %v2971_v29 = vsel %vm1157_vm5, %v6683_v25, 0.0  ;;  %v2314_v52 = vmul.f32 %v7103_v19, %v6896_v22 }
 0x995   :  { %2972 = vadd.xlane.f32.xlu1 %v2971_v29 }
 0x996   :  { %v6685_v30 = vpop.eup %6684  ;;  %v2957_v31 = vmul.f32 1.442695, %v2942_v28 }
 0x997   :  { %v2965_v32 = vsel %vm1157_vm5, %v6685_v30, 0.0 }
 0x998   :  { %6692 = vpow2.f32 %v2957_v31  ;;  %2966 = vadd.xlane.f32.xlu0 %v2965_v32  ;;  %v3687_v31 = vld [vmem:[#allocation2 + $0x150] sm:$0xff]  ;;  %v3688_v32 = vld [vmem:[#allocation2 + $0x158] sm:$0xff] }
 0x99a   :  { %v7156_v35 = vpop.eup %6686 }
 0x99b   :  { %v6689_v36 = vpop.eup %6688  ;;  %v2968_v37 = vsel %vm1157_vm5, %v7156_v35, 0.0 }
 0x99c   :  { %2969 = vadd.xlane.f32.xlu0 %v2968_v37  ;;  %v2974_v38 = vsel %vm1157_vm5, %v6689_v36, 0.0 }
 0x99d   :  { %2975 = vadd.xlane.f32.xlu1 %v2974_v38  ;;  %v5778_v38 = vld [vmem:[%s7409_s3 + $0xa] ss:$0 sm:$0xff] }
 0x99e   :  { %v6691_v39 = vpop.eup %6690 }
 0x99f   :  { %v2977_v40 = vsel %vm1157_vm5, %v6691_v39, 0.0 }
 0x9a1   :  { %2978 = vadd.xlane.f32.xlu1 %v2977_v40 }
 0x9a2   :  { %v7162_v41 = vpop.eup %6692 }
 0x9a3   :  { %v2980_v43 = vsel %vm1157_vm5, %v7162_v41, 0.0 }
 0x9a5   :  { %2981 = vadd.xlane.f32.xlu1 %v2980_v43 }
 0xa1d   :  { %v2961_v44 = vpop.xlane.xlu0 %2960 }
 0xa1e   :  { %6694 = vrcp.f32 %v2961_v44  ;;  %v3798_v44 = vld [vmem:[#allocation2 + $0x160] sm:$0xff] }
 0xa21   :  { %v2964_v46 = vpop.xlane.xlu0 %2963 }
 0xa22   :  { %v2973_v47 = vpop.xlane.xlu1 %2972 }
 0xa23   :  { %6696 = vrcp.f32 %v2973_v47  ;;  %v3889_v47 = vld [vmem:[#allocation2 + $0x180] sm:$0xff] }
 0xa24   :  { %6698 = vrcp.f32 %v2964_v46  ;;  %v3799_v46 = vld [vmem:[#allocation2 + $0x168] sm:$0xff] }
 0xa25   :  { %v2967_v51 = vpop.xlane.xlu0 %2966 }
 0xa28   :  { %v6695_v48 = vpop.eup %6694 }
 0xa29   :  { %v2991_v49 = vmul.f32 %v6695_v48, %v6679_v14  ;;  %v2970_v63 = vpop.xlane.xlu0 %2969  ;;  %v6537_v48 = vpack.c.bf16 %v3799_v46, %v3798_v44  ;;  %v5788_v46 = vld [vmem:[%s7409_s3 + $0xe] ss:$0 sm:$0xff] }
 0xa2a   :  { %v2976_v54 = vpop.xlane.xlu1 %2975 }
 0xa2b   :  { %6700 = vrcp.f32 %v2976_v54  ;;  %6244 = vmatmul.mubr.msk.f32.vlgmr.msra.gmra.mrb[24].mxu0 %vm1157_vm5, %v2991_v49  ;;  %v3890_v49 = vld [vmem:[#allocation2 + $0x188] sm:$0xff] }
 0xa2c   :  { %6702 = vrcp.f32 %v2967_v51  ;;  %6247 = vmatpush3.msra.mxu0 %v2314_v52  ;;  %6248 = vmatprep.mubr.msk.f32.mxu0 %vm6809_vm4, %v6807_v42  ;;  %v3800_v51 = vld [vmem:[#allocation2 + $0x170] sm:$0xff]  ;;  %v6545_v54 = vpack.c.bf16 %v3890_v49, %v3889_v47 }
 0xa2d   :  { %v6697_v53 = vpop.eup %6696  ;;  %6251 = vmatprep.subr.mxu0 %v6807_v42 }
 0xa2e   :  { %v6699_v56 = vpop.eup %6698  ;;  %v2995_v57 = vmul.f32 %v6697_v53, %v6683_v25  ;;  %v2979_v58 = vpop.xlane.xlu1 %2978  ;;  %v3686_v25 = vld [vmem:[#allocation2 + $0x148] sm:$0xff]  ;;  %v3891_v53 = vld [vmem:[#allocation2 + $0x190] sm:$0xff] }
 0xa2f   :  { %v2992_v59 = vmul.f32 %v6699_v56, %v6681_v20  ;;  %6704 = vrcp.f32 %v2979_v58  ;;  %v3593_v20 = vld [vmem:[#allocation2 + $0x138] sm:$0xff]  ;;  %v6529_v27 = vpack.c.bf16 %v3686_v25, %v3685_v26  ;;  %v3975_v58 = vld [vmem:[#allocation2 + $0x1a8] sm:$0xff] }
 0xa30   :  { %6264 = vmatmul.mubr.msk.f32.vlgmr.msra.gmra.mrb[30].mxu1 %vm1157_vm5, %v2995_v57  ;;  %6706 = vrcp.f32 %v2970_v63  ;;  %v6525_v21 = vpack.c.bf16 %v3593_v20, %v3592_v3  ;;  %v3892_v56 = vld [vmem:[#allocation2 + $0x198] sm:$0xff]  ;;  %v5781_v63 = vld [vmem:[%s7409_s3 + $0xb] ss:$0 sm:$0xff] }
 0xa31   :  { %6267 = vmatpush3.msra.mxu1 %v2318_v60  ;;  %6268 = vmatprep.mubr.msk.f32.mxu1 %vm6809_vm4, %v6807_v42  ;;  %v6549_v57 = vpack.c.bf16 %v3892_v56, %v3891_v53  ;;  %v3977_v26 = vld [vmem:[#allocation2 + $0x1b8] sm:$0xff] }
 0xa32   :  { %6271 = vmatprep.subr.mxu1 %v6807_v42  ;;  %v2982_v6 = vpop.xlane.xlu1 %2981 }
 0xa33   :  { %6249 = vmatmul.mubr.msk.f32.vlgmr.msra.gmra.mrb[24].mxu0 %vm1157_vm5, %v2992_v59  ;;  %6708 = vrcp.f32 %v2982_v6 }
 0xa34   :  { %6252 = vmatpush3.msra.mxu0 %v2315_v0  ;;  %6253 = vmatprep.mubr.msk.f32.mxu0 %vm6809_vm4, %v6807_v42 }
 0xa35   :  { %v6701_v1 = vpop.eup %6700  ;;  %6256 = vmatprep.subr.mxu0 %v6807_v42 }
 0xa36   :  { %v6703_v4 = vpop.eup %6702  ;;  %v2996_v5 = vmul.f32 %v6701_v1, %v6689_v36 }
 0xa37   :  { %v2993_v10 = vmul.f32 %v6703_v4, %v6685_v30 }
 0xa38   :  { %6269 = vmatmul.mubr.msk.f32.vlgmr.msra.gmra.mrb[30].mxu1 %vm1157_vm5, %v2996_v5 }
 0xa39   :  { %6272 = vmatpush3.msra.mxu1 %v2319_v9  ;;  %6273 = vmatprep.mubr.msk.f32.mxu1 %vm6809_vm4, %v6807_v42  ;;  %v6705_v13 = vpop.eup %6704 }
 0xa3a   :  { %6276 = vmatprep.subr.mxu1 %v6807_v42  ;;  %v6707_v14 = vpop.eup %6706  ;;  %v2997_v15 = vmul.f32 %v6705_v13, %v6691_v39 }
 0xa3b   :  { %6254 = vmatmul.mubr.msk.f32.vlgmr.msra.gmra.mrb[24].mxu0 %vm1157_vm5, %v2993_v10  ;;  %v2994_v17 = vmul.f32 %v6707_v14, %v7156_v35  ;;  %v6533_v35 = vpack.c.bf16 %v3688_v32, %v3687_v31 }
 0xa3c   :  { %6257 = vmatpush3.msra.mxu0 %v2316_v12  ;;  %6258 = vmatprep.mubr.msk.f32.mxu0 %vm6809_vm4, %v6807_v42 }
 0xa3d   :  { %6522 = vmatprep.subr.bf16.mxu0 %v6521_v11  ;;  %v6709_v19 = vpop.eup %6708 }
 0xa3e   :  { %v2998_v18 = vmul.f32 %v6709_v19, %v7162_v41 }
 0xa40   :  { %6274 = vmatmul.mubr.msk.f32.vlgmr.msra.gmra.mrb[30].mxu1 %vm1157_vm5, %v2997_v15 }
 0xa41   :  { %6277 = vmatpush3.msra.mxu1 %v2320_v16  ;;  %6278 = vmatprep.mubr.msk.f32.mxu1 %vm6809_vm4, %v6807_v42 }
 0xa42   :  { %6530 = vmatprep.subr.bf16.mxu1 %v6529_v27 }
 0xa43   :  { %6259 = vmatmul.mubr.msk.f32.vlgmr.msra.gmra.mrb[24].mxu0 %vm1157_vm5, %v2994_v17 }
 0xa44   :  { %6524 = vmatpush3.bf16.msra.mxu0 %v6521_v11 }
 0xa45   :  { %6526 = vmatprep.subr.bf16.mxu0 %v6525_v21 }
 0xa48   :  { %6279 = vmatmul.mubr.msk.f32.vlgmr.msra.gmra.mrb[30].mxu1 %vm1157_vm5, %v2998_v18  ;;  %6528 = vmatpush3.bf16.msra.mxu0 %v6525_v21  ;;  %v3976_v21 = vld [vmem:[#allocation2 + $0x1b0] sm:$0xff] }
 0xa49   :  { %6532 = vmatpush3.bf16.msra.mxu1 %v6529_v27  ;;  %6538 = vmatprep.subr.bf16.mxu0 %v6537_v48 }
 0xa4a   :  { %6534 = vmatprep.subr.bf16.mxu1 %v6533_v35 }
 0xa4d   :  { %6536 = vmatpush3.bf16.msra.mxu1 %v6533_v35 }
 0xa4e   :  { %6546 = vmatprep.subr.bf16.mxu1 %v6545_v54 }
 0xb16   :  { %v3287_v2 = vpop.f32.mrb[24].mxu0 }
 0xb17   :  { %v6260_v28 = vpop.f32.mrb[25].mxu0  ;;  %6289 = vmatprep.mubr.msk.f32.mxu0 %vm89_vm0, %v3287_v2 }
 0xb18   :  { %v6557_v28 = vpack.c.bf16 %v3977_v26, %v3976_v21 }
 0xb1b   :  { %v3579_v29 = vpop.f32.mrb[30].mxu1 }
 0xb1c   :  { %v6280_v30 = vpop.f32.mrb[31].mxu1  ;;  %6290 = vmatmul.mubr.msk.f32.vlgmr.msra.gmra.mrb[26].mxu0 %vm89_vm0, %v3579_v29  ;;  %v5782_v29 = vld [vmem:[%s7409_s3 + $0xc] ss:$0 sm:$0xff] }
 0xb1d   :  { %6540 = vmatpush3.bf16.msra.mxu0 %v6537_v48  ;;  %v5785_v30 = vld [vmem:[%s7409_s3 + $0xd] ss:$0 sm:$0xff] }
 0xbef   :  { %v6291_v36 = vpop.f32.mrb[26].mxu0 }
 0xbf0   :  { %v3676_v37 = vadd.f32 %v6291_v36, %v7058_v62  ;;  %v3666_v39 = vpop.f32.mrb[27].mxu0  ;;  %v3801_v62 = vld [vmem:[#allocation2 + $0x178] sm:$0xff] }
 0xbf1   :  { %v3675_v40 = vadd.f32 %v3666_v39, %v7056_v61  ;;  %v6541_v52 = vpack.c.bf16 %v3801_v62, %v3800_v51  ;;  %v3974_v61 = vld [vmem:[#allocation2 + $0x1a0] sm:$0xff] }
 0xbf2   :  { %v3683_v43 = vadd.f32 %v5778_v38, %v3676_v37  ;;  %v6553_v60 = vpack.c.bf16 %v3975_v58, %v3974_v61 }
 0xbf3   :  { %v3682_v41 = vadd.f32 %v5778_v38, %v3675_v40  ;;  %6542 = vmatprep.subr.bf16.mxu0 %v6541_v52 }
 0xbf4   :  { %6544 = vmatpush3.bf16.msra.mxu0 %v6541_v52 }
 0xbf5   :  { %6300 = vmatprep.mubr.msk.f32.mxu1 %vm89_vm0, %v3682_v41  ;;  %6554 = vmatprep.subr.bf16.mxu0 %v6553_v60 }
 0xbf6   :  { %6301 = vmatmul.mubr.msk.f32.vlgmr.msra.gmra.mrb[32].mxu1 %vm89_vm0, %v3683_v43 }
 0xbf7   :  { %6548 = vmatpush3.bf16.msra.mxu1 %v6545_v54 }
 0xbf8   :  { %6550 = vmatprep.subr.bf16.mxu1 %v6549_v57 }
 0xbfb   :  { %6552 = vmatpush3.bf16.msra.mxu1 %v6549_v57 }
 0xbfc   :  { %6336 = vmatprep.subr.mxu1 %v6807_v42 }
 0xcc9   :  { %v6302_v59 = vpop.f32.mrb[32].mxu1 }
 0xcca   :  { %v3771_v0 = vadd.f32 %v6302_v59, %v3683_v43  ;;  %v3761_v1 = vpop.f32.mrb[33].mxu1 }
 0xccb   :  { %v3770_v4 = vadd.f32 %v3761_v1, %v3682_v41 }
 0xccc   :  { %v3778_v5 = vadd.f32 %v5781_v63, %v3771_v0 }
 0xccd   :  { %v3777_v6 = vadd.f32 %v5781_v63, %v3770_v4 }
 0xcce   :  { %v3782_v7 = vmul.f32 0.044715, %v3778_v5  ;;  %v3780_v25 = vmul.f32 0.5, %v3778_v5 }
 0xccf   :  { %v3781_v8 = vmul.f32 0.044715, %v3777_v6  ;;  %v3779_v3 = vmul.f32 0.5, %v3777_v6 }
 0xcd0   :  { %v3784_v9 = vmul.f32 %v3782_v7, %v3778_v5 }
 0xcd1   :  { %v3783_v10 = vmul.f32 %v3781_v8, %v3777_v6 }
 0xcd2   :  { %v3786_v11 = vmul.f32 %v3784_v9, %v3778_v5 }
 0xcd3   :  { %v3785_v12 = vmul.f32 %v3783_v10, %v3777_v6 }
 0xcd4   :  { %v3788_v13 = vadd.f32 %v3786_v11, %v3778_v5 }
 0xcd5   :  { %v3787_v14 = vadd.f32 %v3785_v12, %v3777_v6 }
 0xcd6   :  { %v3790_v15 = vmul.f32 0.7978846, %v3788_v13 }
 0xcd7   :  { %v3789_v16 = vmul.f32 0.7978846, %v3787_v14 }
 0xcd8   :  { %6710 = vtanh.f32 %v3790_v15 }
 0xcd9   :  { %6712 = vtanh.f32 %v3789_v16 }
 0xce2   :  { %v6711_v17 = vpop.eup %6710 }
 0xce3   :  { %v6713_v19 = vpop.eup %6712  ;;  %v3794_v18 = vadd.f32 1.0, %v6711_v17 }
 0xce4   :  { %v3793_v20 = vadd.f32 1.0, %v6713_v19 }
 0xce5   :  { %v7219_v2 = vmul.f32 %v3794_v18, %v3780_v25 }
 0xce6   :  { %v7217_v27 = vmul.f32 %v3793_v20, %v3779_v3 }
 0xce8   :  { %6311 = vmatprep.mubr.msk.f32.mxu0 %vm89_vm0, %v7217_v27  ;;  %6322 = vmatprep.mubr.msk.f32.mxu1 %vm89_vm0, %v7217_v27 }
 0xce9   :  { %6312 = vmatmul.mubr.msk.f32.vlgmr.msra.gmra.mrb[28].mxu0 %vm89_vm0, %v7219_v2  ;;  %6323 = vmatmul.mubr.msk.f32.vlgmr.msra.gmra.mrb[34].mxu1 %vm89_vm0, %v7219_v2 }
 0xcea   :  { %6556 = vmatpush3.bf16.msra.mxu0 %v6553_v60  ;;  %6333 = vmatprep.mubr.msk.f32.mxu0 %vm89_vm0, %v7217_v27 }
 0xceb   :  { %6558 = vmatprep.subr.bf16.mxu0 %v6557_v28  ;;  %6338 = vmatprep.mubr.msk.f32.mxu1 %vm6809_vm4, %v6807_v42 }
 0xcee   :  { %6560 = vmatpush3.bf16.msra.mxu0 %v6557_v28 }
 0xcef   :  { %6346 = vmatprep.subr.mxu0 %v6807_v42 }
 0xcf1   :  { %6334 = vmatmul.mubr.msk.f32.vlgmr.msra.gmra.mrb[30].mxu0 %vm89_vm0, %v7219_v2 }
 0xcf2   :  { %6348 = vmatprep.mubr.msk.f32.mxu0 %vm6809_vm4, %v6807_v42 }
 0xdbc   :  { %v6313_v31 = vpop.f32.mrb[28].mxu0  ;;  %v6324_v32 = vpop.f32.mrb[34].mxu1 }
 0xdbd   :  { %v3879_v35 = vpop.f32.mrb[29].mxu0  ;;  %v3964_v36 = vpop.f32.mrb[35].mxu1  ;;  %v3885_v41 = vadd.f32 %v6313_v31, %v5782_v29  ;;  %v3970_v43 = vadd.f32 %v6324_v32, %v5785_v30 }
 0xdbe   :  { %v3880_v37 = vadd.f32 %v5782_v29, %v3879_v35  ;;  %v3965_v38 = vadd.f32 %v5785_v30, %v3964_v36 }
 0xdbf   :  { %v4062_v49 = vmul.f32 %v3885_v41, %v6908_v33  ;;  %v4063_v52 = vmul.f32 %v3885_v41, %v6915_v45 }
 0xdc0   :  { %v4058_v39 = vmul.f32 %v3880_v37, %v6908_v33  ;;  %v4060_v40 = vmul.f32 %v3880_v37, %v6910_v34  ;;  %6337 = vmatpush3.xpose.msk.msra.mxu1 %vm89_vm0, %v3965_v38  ;;  %6347 = vmatpush3.xpose.msk.msra.mxu0 %vm89_vm0, %v3965_v38  ;;  %v4059_v47 = vmul.f32 %v3880_v37, %v6915_v45 }
 0xdc1   :  { %6341 = vmatprep.subr.mxu1 %v6807_v42  ;;  %6356 = vmatprep.subr.mxu0 %v6807_v42  ;;  %v4061_v62 = vmul.f32 %v3880_v37, %v6926_v50  ;;  %v4064_v33 = vmul.f32 %v3885_v41, %v6910_v34  ;;  %v4065_v45 = vmul.f32 %v3885_v41, %v6926_v50 }
 0xdc3   :  { %6339 = vmatmul.mubr.msk.f32.vlgmr.msra.gmra.mrb[36].mxu1 %vm89_vm0, %v4058_v39  ;;  %6349 = vmatmul.mubr.msk.f32.vlgmr.msra.gmra.mrb[32].mxu0 %vm89_vm0, %v4060_v40 }
 0xdc4   :  { %v6335_v44 = vpop.f32.mrb[30].mxu0  ;;  %6342 = vmatpush3.xpose.msk.msra.mxu1 %vm89_vm0, %v3965_v38  ;;  %6357 = vmatpush3.xpose.msk.msra.mxu0 %vm89_vm0, %v3970_v43 }
 0xdc5   :  { %v4049_v48 = vpop.f32.mrb[31].mxu0  ;;  %6343 = vmatprep.mubr.msk.f32.mxu1 %vm6809_vm4, %v6807_v42  ;;  %6358 = vmatprep.mubr.msk.f32.mxu0 %vm6809_vm4, %v6807_v42  ;;  %v7287_v34 = vadd.f32 %v6335_v44, %v5788_v46 }
 0xdc6   :  { %6351 = vmatprep.subr.mxu1 %v6807_v42  ;;  %v7264_v51 = vadd.f32 %v5788_v46, %v4049_v48  ;;  %6366 = vmatprep.subr.mxu0 %v6807_v42 }
 0xdc7   :  { %6344 = vmatmul.mubr.msk.f32.vlgmr.msra.gmra.mrb[38].mxu1 %vm89_vm0, %v4059_v47  ;;  %6359 = vmatmul.mubr.msk.f32.vlgmr.msra.gmra.mrb[34].mxu0 %vm89_vm0, %v4062_v49  ;;  %v4070_v53 = vmul.f32 %v7287_v34, %v6940_v55 }
 0xdc8   :  { %6352 = vmatpush3.xpose.msk.msra.mxu1 %vm89_vm0, %v3965_v38  ;;  %6367 = vmatpush3.xpose.msk.msra.mxu0 %vm89_vm0, %v3970_v43  ;;  %v4066_v54 = vmul.f32 %v7264_v51, %v6940_v55 }
 0xdc9   :  { %6353 = vmatprep.mubr.msk.f32.mxu1 %vm6809_vm4, %v6807_v42  ;;  %6368 = vmatprep.mubr.msk.f32.mxu0 %vm6809_vm4, %v6807_v42 }
 0xdca   :  { %6361 = vmatprep.subr.mxu1 %v6807_v42  ;;  %6376 = vmatprep.subr.mxu0 %v6807_v42 }
 0xdcb   :  { %6354 = vmatmul.mubr.msk.f32.vlgmr.msra.gmra.mrb[40].mxu1 %vm89_vm0, %v4061_v62  ;;  %6369 = vmatmul.mubr.msk.f32.vlgmr.msra.gmra.mrb[36].mxu0 %vm89_vm0, %v4064_v33 }
 0xdcc   :  { %6362 = vmatpush3.xpose.msk.msra.mxu1 %vm89_vm0, %v3970_v43  ;;  %6377 = vmatpush3.msra.mxu0 %v4066_v54 }
 0xdcd   :  { %6363 = vmatprep.mubr.msk.f32.mxu1 %vm6809_vm4, %v6807_v42  ;;  %6371 = vmatprep.subr.mxu1 %v6807_v42 }
 0xdce   :  { %6378 = vmatprep.mubr.msk.f32.mxu0 %vm6809_vm4, %v6807_v42  ;;  %6381 = vmatprep.subr.mxu0 %v6807_v42 }
 0xdcf   :  { %6364 = vmatmul.mubr.msk.f32.vlgmr.msra.gmra.mrb[42].mxu1 %vm89_vm0, %v4063_v52 }
 0xdd0   :  { %6372 = vmatpush3.xpose.msk.msra.mxu1 %vm89_vm0, %v3970_v43  ;;  %6373 = vmatprep.mubr.msk.f32.mxu1 %vm6809_vm4, %v6807_v42 }
 0xdd1   :  { %6396 = vmatprep.subr.mxu1 %v6807_v42 }
 0xdd3   :  { %6374 = vmatmul.mubr.msk.f32.vlgmr.msra.gmra.mrb[44].mxu1 %vm89_vm0, %v4065_v45 }
 0xdd4   :  { %6397 = vmatpush3.msra.mxu1 %v4070_v53  ;;  %6398 = vmatprep.mubr.msk.f32.mxu1 %vm6809_vm4, %v6807_v42 }
 0xdd5   :  { %6401 = vmatprep.subr.mxu1 %v6807_v42 }
 0xe96   :  { %v4146_v56 = vpop.f32.mrb[36].mxu1  ;;  %v4292_v57 = vpop.f32.mrb[32].mxu0 }
 0xe97   :  { %v6340_v61 = vpop.f32.mrb[37].mxu1  ;;  %v4664_v58 = vsel %vm1157_vm5, %v4146_v56, -inf  ;;  %v6350_v60 = vpop.f32.mrb[33].mxu0  ;;  %v4670_v7 = vsel %vm1157_vm5, %v4292_v57, -inf }
 0xe98   :  { %4665 = vmax.xlane.f32.xlu0 %v4664_v58 }
 0xe9a   :  { %v4219_v50 = vpop.f32.mrb[38].mxu1  ;;  %v4441_v59 = vpop.f32.mrb[34].mxu0 }
 0xe9b   :  { %v6345_v63 = vpop.f32.mrb[39].mxu1  ;;  %v4667_v55 = vsel %vm1157_vm5, %v4219_v50, -inf  ;;  %v6360_v0 = vpop.f32.mrb[35].mxu0  ;;  %v4676_v1 = vsel %vm1157_vm5, %v4441_v59, -inf }
 0xe9c   :  { %4668 = vmax.xlane.f32.xlu0 %v4667_v55  ;;  %4677 = vmax.xlane.f32.xlu1 %v4676_v1 }
 0xe9e   :  { %v4365_v4 = vpop.f32.mrb[40].mxu1  ;;  %v4587_v5 = vpop.f32.mrb[36].mxu0 }
 0xe9f   :  { %v6355_v6 = vpop.f32.mrb[41].mxu1  ;;  %v6370_v8 = vpop.f32.mrb[37].mxu0  ;;  %v4673_v11 = vsel %vm1157_vm5, %v4365_v4, -inf  ;;  %v4682_v15 = vsel %vm1157_vm5, %v4587_v5, -inf }
 0xea0   :  { %4671 = vmax.xlane.f32.xlu0 %v4670_v7  ;;  %v4067_v8 = vmul.f32 %v7264_v51, %v6896_v22 }
 0xea2   :  { %v4514_v9 = vpop.f32.mrb[42].mxu1 }
 0xea3   :  { %v6365_v10 = vpop.f32.mrb[43].mxu1  ;;  %v4679_v12 = vsel %vm1157_vm5, %v4514_v9, -inf }
 0xea4   :  { %4674 = vmax.xlane.f32.xlu0 %v4673_v11  ;;  %4680 = vmax.xlane.f32.xlu1 %v4679_v12 }
 0xea6   :  { %v4660_v13 = vpop.f32.mrb[44].mxu1 }
 0xea7   :  { %v6375_v14 = vpop.f32.mrb[45].mxu1  ;;  %v4685_v16 = vsel %vm1157_vm5, %v4660_v13, -inf }
 0xea8   :  { %4683 = vmax.xlane.f32.xlu1 %v4682_v15 }
 0xeac   :  { %4686 = vmax.xlane.f32.xlu1 %v4685_v16  ;;  %v4068_v16 = vmul.f32 %v7264_v51, %v6898_v23 }
 0xf25   :  { %v4666_v17 = vpop.xlane.xlu0 %4665 }
 0xf26   :  { %v4688_v19 = vsub.f32 %v4146_v56, %v4666_v17 }
 0xf28   :  { %v4696_v18 = vmul.f32 1.442695, %v4688_v19 }
 0xf29   :  { %v4669_v3 = vpop.xlane.xlu0 %4668  ;;  %v4678_v20 = vpop.xlane.xlu1 %4677 }
 0xf2a   :  { %6714 = vpow2.f32 %v4696_v18  ;;  %v4689_v21 = vsub.f32 %v4219_v50, %v4669_v3  ;;  %v4692_v26 = vsub.f32 %v4441_v59, %v4678_v20  ;;  %v5343_v3 = vld [vmem:[#allocation2 + $0x1c0] sm:$0xff]  ;;  %v5344_v20 = vld [vmem:[#allocation2 + $0x1c8] sm:$0xff] }
 0xf2c   :  { %v4698_v25 = vmul.f32 1.442695, %v4689_v21  ;;  %v4704_v28 = vmul.f32 1.442695, %v4692_v26  ;;  %v4072_v21 = vmul.f32 %v7287_v34, %v6898_v23 }
 0xf2d   :  { %v4672_v29 = vpop.xlane.xlu0 %4671 }
 0xf2e   :  { %6716 = vpow2.f32 %v4698_v25  ;;  %v4690_v30 = vsub.f32 %v4292_v57, %v4672_v29  ;;  %v6561_v25 = vpack.c.bf16 %v5344_v20, %v5343_v3  ;;  %v5821_v3 = vld [vmem:[%s7409_s3 + $0x11] ss:$0 sm:$0xff] }
 0xf2f   :  { %6718 = vpow2.f32 %v4704_v28  ;;  %v4069_v28 = vmul.f32 %v7264_v51, %v6900_v24 }
 0xf30   :  { %v4700_v31 = vmul.f32 1.442695, %v4690_v30 }
 0xf31   :  { %v4675_v32 = vpop.xlane.xlu0 %4674  ;;  %v4681_v35 = vpop.xlane.xlu1 %4680 }
 0xf32   :  { %6720 = vpow2.f32 %v4700_v31  ;;  %v4691_v36 = vsub.f32 %v4365_v4, %v4675_v32  ;;  %v4693_v37 = vsub.f32 %v4514_v9, %v4681_v35  ;;  %v4073_v31 = vmul.f32 %v7287_v34, %v6900_v24  ;;  %v5438_v24 = vld [vmem:[#allocation2 + $0x1e0] sm:$0xff] }
 0xf34   :  { %v6715_v38 = vpop.eup %6714  ;;  %v4702_v39 = vmul.f32 1.442695, %v4691_v36  ;;  %v4706_v40 = vmul.f32 1.442695, %v4693_v37  ;;  %v5345_v36 = vld [vmem:[#allocation2 + $0x1d0] sm:$0xff]  ;;  %v5346_v37 = vld [vmem:[#allocation2 + $0x1d8] sm:$0xff] }
 0xf35   :  { %v4684_v41 = vpop.xlane.xlu1 %4683  ;;  %v4712_v43 = vsel %vm1157_vm5, %v6715_v38, 0.0 }
 0xf36   :  { %6722 = vpow2.f32 %v4702_v39  ;;  %v4694_v44 = vsub.f32 %v4587_v5, %v4684_v41  ;;  %4713 = vadd.xlane.f32.xlu0 %v4712_v43 }
 0xf37   :  { %6724 = vpow2.f32 %v4706_v40 }
 0xf38   :  { %v6717_v46 = vpop.eup %6716  ;;  %v4708_v47 = vmul.f32 1.442695, %v4694_v44  ;;  %v5440_v44 = vld [vmem:[#allocation2 + $0x1f0] sm:$0xff] }
 0xf39   :  { %v6719_v48 = vpop.eup %6718  ;;  %v4687_v49 = vpop.xlane.xlu1 %4686  ;;  %v4715_v62 = vsel %vm1157_vm5, %v6717_v46, 0.0 }
 0xf3a   :  { %6726 = vpow2.f32 %v4708_v47  ;;  %v4695_v33 = vsub.f32 %v4660_v13, %v4687_v49  ;;  %4716 = vadd.xlane.f32.xlu0 %v4715_v62  ;;  %v4724_v54 = vsel %vm1157_vm5, %v6719_v48, 0.0  ;;  %v4071_v13 = vmul.f32 %v7287_v34, %v6896_v22  ;;  %v5439_v34 = vld [vmem:[#allocation2 + $0x1e8] sm:$0xff] }
 0xf3b   :  { %4725 = vadd.xlane.f32.xlu1 %v4724_v54  ;;  %v6569_v39 = vpack.c.bf16 %v5439_v34, %v5438_v24  ;;  %v5817_v62 = vld [vmem:[%s7409_s3 + $0xf] ss:$0 sm:$0xff] }
 0xf3c   :  { %v6721_v52 = vpop.eup %6720  ;;  %v4710_v45 = vmul.f32 1.442695, %v4695_v33 }
 0xf3d   :  { %v4718_v53 = vsel %vm1157_vm5, %v6721_v52, 0.0 }
 0xf3e   :  { %6728 = vpow2.f32 %v4710_v45  ;;  %4719 = vadd.xlane.f32.xlu0 %v4718_v53  ;;  %v5550_v53 = vld [vmem:[%s7410_s4] sm:$0xff] }
 0xf40   :  { %v7317_v56 = vpop.eup %6722 }
 0xf41   :  { %v6725_v57 = vpop.eup %6724  ;;  %v4721_v61 = vsel %vm1157_vm5, %v7317_v56, 0.0 }
 0xf42   :  { %4722 = vadd.xlane.f32.xlu0 %v4721_v61  ;;  %v4727_v58 = vsel %vm1157_vm5, %v6725_v57, 0.0 }
 0xf43   :  { %4728 = vadd.xlane.f32.xlu1 %v4727_v58 }
 0xf44   :  { %v6727_v60 = vpop.eup %6726 }
 0xf45   :  { %v4730_v50 = vsel %vm1157_vm5, %v6727_v60, 0.0 }
 0xf47   :  { %4731 = vadd.xlane.f32.xlu1 %v4730_v50 }
 0xf48   :  { %v7323_v59 = vpop.eup %6728 }
 0xf49   :  { %v4733_v63 = vsel %vm1157_vm5, %v7323_v59, 0.0 }
 0xf4b   :  { %4734 = vadd.xlane.f32.xlu1 %v4733_v63 }
 0xfc3   :  { %v4714_v55 = vpop.xlane.xlu0 %4713 }
 0xfc4   :  { %6730 = vrcp.f32 %v4714_v55 }
 0xfc7   :  { %v4717_v0 = vpop.xlane.xlu0 %4716 }
 0xfc8   :  { %v4726_v1 = vpop.xlane.xlu1 %4725 }
 0xfc9   :  { %6732 = vrcp.f32 %v4726_v1 }
 0xfca   :  { %6734 = vrcp.f32 %v4717_v0 }
 0xfcb   :  { %v4720_v6 = vpop.xlane.xlu0 %4719 }
 0xfce   :  { %v6731_v4 = vpop.eup %6730 }
 0xfcf   :  { %v4744_v5 = vmul.f32 %v6731_v4, %v6715_v38  ;;  %v4723_v15 = vpop.xlane.xlu0 %4722  ;;  %v6565_v38 = vpack.c.bf16 %v5346_v37, %v5345_v36 }
 0xfd0   :  { %v4729_v7 = vpop.xlane.xlu1 %4728 }
 0xfd1   :  { %6736 = vrcp.f32 %v4729_v7  ;;  %6379 = vmatmul.mubr.msk.f32.vlgmr.msra.gmra.mrb[38].mxu0 %vm1157_vm5, %v4744_v5 }
 0xfd2   :  { %6738 = vrcp.f32 %v4720_v6  ;;  %6382 = vmatpush3.msra.mxu0 %v4067_v8  ;;  %6383 = vmatprep.mubr.msk.f32.mxu0 %vm6809_vm4, %v6807_v42 }
 0xfd3   :  { %v6733_v9 = vpop.eup %6732  ;;  %6386 = vmatprep.subr.mxu0 %v6807_v42 }
 0xfd4   :  { %v6735_v10 = vpop.eup %6734  ;;  %v4748_v11 = vmul.f32 %v6733_v9, %v6719_v48  ;;  %v4732_v12 = vpop.xlane.xlu1 %4731 }
 0xfd5   :  { %v4745_v14 = vmul.f32 %v6735_v10, %v6717_v46  ;;  %6740 = vrcp.f32 %v4732_v12  ;;  %v5441_v46 = vld [vmem:[#allocation2 + $0x1f8] sm:$0xff] }
 0xfd6   :  { %6399 = vmatmul.mubr.msk.f32.vlgmr.msra.gmra.mrb[46].mxu1 %vm1157_vm5, %v4748_v11  ;;  %6742 = vrcp.f32 %v4723_v15  ;;  %v6573_v47 = vpack.c.bf16 %v5441_v46, %v5440_v44 }
 0xfd7   :  { %6402 = vmatpush3.msra.mxu1 %v4071_v13  ;;  %6403 = vmatprep.mubr.msk.f32.mxu1 %vm6809_vm4, %v6807_v42 }
 0xfd8   :  { %6406 = vmatprep.subr.mxu1 %v6807_v42  ;;  %v4735_v18 = vpop.xlane.xlu1 %4734 }
 0xfd9   :  { %6384 = vmatmul.mubr.msk.f32.vlgmr.msra.gmra.mrb[38].mxu0 %vm1157_vm5, %v4745_v14  ;;  %6744 = vrcp.f32 %v4735_v18 }
 0xfda   :  { %6387 = vmatpush3.msra.mxu0 %v4068_v16  ;;  %6388 = vmatprep.mubr.msk.f32.mxu0 %vm6809_vm4, %v6807_v42 }
 0xfdb   :  { %v6737_v22 = vpop.eup %6736  ;;  %6391 = vmatprep.subr.mxu0 %v6807_v42 }
 0xfdc   :  { %v6739_v17 = vpop.eup %6738  ;;  %v4749_v19 = vmul.f32 %v6737_v22, %v6725_v57 }
 0xfdd   :  { %v4746_v26 = vmul.f32 %v6739_v17, %v6721_v52 }
 0xfde   :  { %6404 = vmatmul.mubr.msk.f32.vlgmr.msra.gmra.mrb[46].mxu1 %vm1157_vm5, %v4749_v19 }
 0xfdf   :  { %6407 = vmatpush3.msra.mxu1 %v4072_v21  ;;  %6408 = vmatprep.mubr.msk.f32.mxu1 %vm6809_vm4, %v6807_v42  ;;  %v6741_v29 = vpop.eup %6740 }
 0xfe0   :  { %6411 = vmatprep.subr.mxu1 %v6807_v42  ;;  %v6743_v23 = vpop.eup %6742  ;;  %v4750_v30 = vmul.f32 %v6741_v29, %v6727_v60  ;;  %v5820_v60 = vld [vmem:[%s7409_s3 + $0x10] ss:$0 sm:$0xff]  ;;  %s6810_s3 = smov [#allocation5]  }
 0xfe1   :  { %6389 = vmatmul.mubr.msk.f32.vlgmr.msra.gmra.mrb[38].mxu0 %vm1157_vm5, %v4746_v26  ;;  %v4747_v32 = vmul.f32 %v6743_v23, %v7317_v56  ;;  %v5552_v56 = vld [vmem:[%s7410_s4 + $0x10] sm:$0xff]  ;;  %s5689_s27 = sshll.u32 %s6810_s3, 4  ;;  %s5690_s27 = int_to_ptr.vmem [resolvable:$true] %s5689_s27 }
 0xfe2   :  { %6392 = vmatpush3.msra.mxu0 %v4069_v28  ;;  %6393 = vmatprep.mubr.msk.f32.mxu0 %vm6809_vm4, %v6807_v42  ;;  %s6776_s28 = scalar_lea.vmem %s5690_s27, 32  ;;  %p6781_p9 = scmp.lt.s32.totalorder %s5690_s27, %s5690_s27 }
 0xfe3   :  { %6562 = vmatprep.subr.bf16.mxu0 %v6561_v25  ;;  %v6745_v51 = vpop.eup %6744  ;;  %p6777_p8 = scmp.ne.s32.totalorder %s5690_s27, %s6776_s28  ;;  %p6782_p10 = scmp.lt.s32.totalorder %s6776_s28, %s6776_s28 }
 0xfe4   :  { %v4751_v35 = vmul.f32 %v6745_v51, %v7323_v59 }
 0xfe5   :  { %p6783_p11 = por %p6782_p10, %p6781_p9 }
 0xfe6   :  { %6409 = vmatmul.mubr.msk.f32.vlgmr.msra.gmra.mrb[46].mxu1 %vm1157_vm5, %v4750_v30 }
 0xfe7   :  { %6412 = vmatpush3.msra.mxu1 %v4073_v31  ;;  %6413 = vmatprep.mubr.msk.f32.mxu1 %vm6809_vm4, %v6807_v42  ;;  %p6784_p12 = pnand %p6783_p11, %p6777_p8 }
 0xfe8   :  { %6570 = vmatprep.subr.bf16.mxu1 %v6569_v39 }
 0xfe9   :  { %6394 = vmatmul.mubr.msk.f32.vlgmr.msra.gmra.mrb[38].mxu0 %vm1157_vm5, %v4747_v32 }
 0xfea   :  { %6564 = vmatpush3.bf16.msra.mxu0 %v6561_v25 }
 0xfeb   :  { %6566 = vmatprep.subr.bf16.mxu0 %v6565_v38 }
 0xfee   :  { %6414 = vmatmul.mubr.msk.f32.vlgmr.msra.gmra.mrb[46].mxu1 %vm1157_vm5, %v4751_v35  ;;  %6568 = vmatpush3.bf16.msra.mxu0 %v6565_v38 }
 0xfef   :  { %6572 = vmatpush3.bf16.msra.mxu1 %v6569_v39 }
 0xff0   :  { %6574 = vmatprep.subr.bf16.mxu1 %v6573_v47 }
 0xff3   :  { %6576 = vmatpush3.bf16.msra.mxu1 %v6573_v47 }
0x10bc   :  { %v5040_v40 = vpop.f32.mrb[38].mxu0 }
0x10bd   :  { %v6395_v42 = vpop.f32.mrb[39].mxu0  ;;  %6424 = vmatprep.mubr.msk.f32.mxu0 %vm89_vm0, %v5040_v40 }
0x10c1   :  { %v5332_v41 = vpop.f32.mrb[46].mxu1 }
0x10c2   :  { %v6415_v43 = vpop.f32.mrb[47].mxu1  ;;  %6425 = vmatmul.mubr.msk.f32.vlgmr.msra.gmra.mrb[40].mxu0 %vm89_vm0, %v5332_v41 }
0x1195   :  { %v6426_v48 = vpop.f32.mrb[40].mxu0 }
0x1196   :  { %v5429_v49 = vadd.f32 %v6426_v48, %v7219_v2  ;;  %v5419_v33 = vpop.f32.mrb[41].mxu0  ;;  %v5551_v2 = vld [vmem:[%s7410_s4 + $0x8] sm:$0xff] }
0x1197   :  { %v5428_v54 = vadd.f32 %v5419_v33, %v7217_v27  ;;  %v6577_v57 = vpack.c.bf16 %v5551_v2, %v5550_v53  ;;  %v5553_v27 = vld [vmem:[%s7410_s4 + $0x18] sm:$0xff] }
0x1198   :  { %v5436_v45 = vadd.f32 %v5817_v62, %v5429_v49  ;;  %v6581_v61 = vpack.c.bf16 %v5553_v27, %v5552_v56 }
0x1199   :  { %v5435_v52 = vadd.f32 %v5817_v62, %v5428_v54  ;;  %6578 = vmatprep.subr.bf16.mxu0 %v6577_v57 }
0x119a   :  { %6580 = vmatpush3.bf16.msra.mxu0 %v6577_v57 }
0x119b   :  { %6435 = vmatprep.mubr.msk.f32.mxu1 %vm89_vm0, %v5435_v52  ;;  %6582 = vmatprep.subr.bf16.mxu0 %v6581_v61 }
0x119c   :  { %6436 = vmatmul.mubr.msk.f32.vlgmr.msra.gmra.mrb[48].mxu1 %vm89_vm0, %v5436_v45 }
0x119e   :  { %6584 = vmatpush3.bf16.msra.mxu0 %v6581_v61 }
0x126f   :  { %v6437_v58 = vpop.f32.mrb[48].mxu1 }
0x1270   :  { %v5524_v50 = vadd.f32 %v6437_v58, %v5436_v45  ;;  %v5514_v59 = vpop.f32.mrb[49].mxu1 }
0x1271   :  { %v5523_v63 = vadd.f32 %v5514_v59, %v5435_v52 }
0x1272   :  { %v5531_v55 = vadd.f32 %v5820_v60, %v5524_v50 }
0x1273   :  { %v5530_v0 = vadd.f32 %v5820_v60, %v5523_v63 }
0x1274   :  { %v5535_v1 = vmul.f32 0.044715, %v5531_v55  ;;  %v5533_v17 = vmul.f32 0.5, %v5531_v55 }
0x1275   :  { %v5534_v4 = vmul.f32 0.044715, %v5530_v0  ;;  %v5532_v16 = vmul.f32 0.5, %v5530_v0 }
0x1276   :  { %v5537_v5 = vmul.f32 %v5535_v1, %v5531_v55 }
0x1277   :  { %v5536_v6 = vmul.f32 %v5534_v4, %v5530_v0 }
0x1278   :  { %v5539_v7 = vmul.f32 %v5537_v5, %v5531_v55 }
0x1279   :  { %v5538_v8 = vmul.f32 %v5536_v6, %v5530_v0 }
0x127a   :  { %v5541_v9 = vadd.f32 %v5539_v7, %v5531_v55 }
0x127b   :  { %v5540_v10 = vadd.f32 %v5538_v8, %v5530_v0 }
0x127c   :  { %v5543_v11 = vmul.f32 0.7978846, %v5541_v9 }
0x127d   :  { %v5542_v12 = vmul.f32 0.7978846, %v5540_v10 }
0x127e   :  { %6746 = vtanh.f32 %v5543_v11 }
0x127f   :  { %6748 = vtanh.f32 %v5542_v12 }
0x1288   :  { %v6747_v13 = vpop.eup %6746 }
0x1289   :  { %v6749_v14 = vpop.eup %6748  ;;  %v5547_v15 = vadd.f32 1.0, %v6747_v13 }
0x128a   :  { %v5546_v22 = vadd.f32 1.0, %v6749_v14 }
0x128b   :  { %v5549_v18 = vmul.f32 %v5547_v15, %v5533_v17 }
0x128c   :  { %v5548_v19 = vmul.f32 %v5546_v22, %v5532_v16 }
0x128e   :  { %6446 = vmatprep.mubr.msk.f32.mxu0 %vm89_vm0, %v5548_v19 }
0x128f   :  { %6447 = vmatmul.mubr.msk.f32.vlgmr.msra.gmra.mrb[42].mxu0 %vm89_vm0, %v5549_v18 }
0x1362   :  { %v6448_v20 = vpop.f32.mrb[42].mxu0 }
0x1363   :  { %v5637_v21 = vadd.f32 %v6448_v20, %v5821_v3  ;;  %v5631_v26 = vpop.f32.mrb[43].mxu0 }
0x1364   :  { %v5632_v25 = vadd.f32 %v5821_v3, %v5631_v26 }
0x1365   :  { %v5643_v28 = vmul.f32 0.044715, %v5637_v21  ;;  %v5641_v34 = vmul.f32 0.5, %v5637_v21 }
0x1366   :  { %v5642_v29 = vmul.f32 0.044715, %v5632_v25  ;;  %v5640_v40 = vmul.f32 0.5, %v5632_v25 }
0x1367   :  { %v5645_v23 = vmul.f32 %v5643_v28, %v5637_v21 }
0x1368   :  { %v5644_v30 = vmul.f32 %v5642_v29, %v5632_v25 }
0x1369   :  { %v5647_v31 = vmul.f32 %v5645_v23, %v5637_v21 }
0x136a   :  { %v5646_v32 = vmul.f32 %v5644_v30, %v5632_v25 }
0x136b   :  { %v5649_v51 = vadd.f32 %v5647_v31, %v5637_v21 }
0x136c   :  { %v5648_v35 = vadd.f32 %v5646_v32, %v5632_v25 }
0x136d   :  { %v5651_v36 = vmul.f32 0.7978846, %v5649_v51 }
0x136e   :  { %v5650_v37 = vmul.f32 0.7978846, %v5648_v35 }
0x136f   :  { %6750 = vtanh.f32 %v5651_v36 }
0x1370   :  { %6752 = vtanh.f32 %v5650_v37 }
0x1379   :  { %v6751_v38 = vpop.eup %6750 }
0x137a   :  { %v6753_v24 = vpop.eup %6752  ;;  %v5655_v39 = vadd.f32 1.0, %v6751_v38 }
0x137b   :  { %v5654_v42 = vadd.f32 1.0, %v6753_v24 }
0x137c   :  { %v5657_v41 = vmul.f32 %v5655_v39, %v5641_v34 }
0x137d   :  { %v5656_v43 = vmul.f32 %v5654_v42, %v5640_v40 }
0x137e   :  { %v5666_v44 = vsel %vm5658_vm6, %v5657_v41, 0.0 }
0x137f   :  { %v5659_v46 = vsel %vm5658_vm6, %v5656_v43, 0.0  ;;  %v5667_v47 = vrot.slane %v5666_v44, 4 }
0x1380   :  { %v5660_v48 = vrot.slane %v5659_v46, 4 }
0x1381   :  { %v5668_v49 = vadd.f32 %v5667_v47, %v5666_v44 }
0x1382   :  { %v5661_v62 = vadd.f32 %v5660_v48, %v5659_v46 }
0x1383   :  { %v5669_v33 = vrot.slane %v5668_v49, 2 }
0x1384   :  { %v5662_v54 = vrot.slane %v5661_v62, 2 }
0x1385   :  { %v5670_v52 = vadd.f32 %v5669_v33, %v5668_v49 }
0x1386   :  { %v5663_v45 = vadd.f32 %v5662_v54, %v5661_v62 }
0x1387   :  { %v5671_v53 = vrot.slane %v5670_v52, 1 }
0x1388   :  { %v5664_v2 = vrot.slane %v5663_v45, 1 }
0x1389   :  { %v5672_v56 = vadd.f32 %v5671_v53, %v5670_v52 }
0x138a   :  { %v5665_v57 = vadd.f32 %v5664_v2, %v5663_v45 }
0x138b   :  { %v5675_v27 = vmul.f32 0.125, %v5672_v56 }
0x138c   :  { %v5674_v61 = vmul.f32 0.125, %v5665_v57 }
0x138e   :  { %v5679_v58 = vsel %vm5678_vm7, %v5675_v27, %v5674_v61 }
0x138f   :  { %5682 = vst.msk [vmem:[#allocation5] sm:$0x3] %vm5681_vm8, %v5679_v58 }
0x1390   :  { %6787 = shalt.err (!%p6784_p12)
}
0x1391   :  { %s6788_s6 = scalar_lea.hbm %s7411_s5, 32 }
0x1392   :  { %p6789_p13 = scmp.ne.s32.totalorder %s7411_s5, %s6788_s6  ;;  %p6792_p0 = scmp.lt.u32.totalorder %s6788_s6, %s7411_s5 }
0x1394   :  { %p6794_p1 = pnand %p6792_p0, %p6789_p13 }
0x1396   :  { %6797 = shalt.err (!%p6794_p1)
}
0x1397   :  { %5692 = dma.vmem_to_hbm [thread:$0]  %s5690_s27, 32, %s7411_s5, [#allocation4]  }
0x1398   :  { %6800 = dma.done.wait [#allocation4], 32  }
0x1399   :  { %6801 = vsyncadd [#allocation4], 4294967264 }
0x139a   :  { %5696 = vsyncpa [#allocation3], 1 }
0x139b   :  { %5697 = vsyncpa [#allocation4], 1 }

</bundles_post_ra>
